<compile_context>
chip_gen: v7x
topology: tpu7x:2x2x1
jax: 0.10.0
libtpu: 0.0.40
codegen_flags: <defaults>
</compile_context>

<pallas_src>
import functools

import jax
import jax.numpy as jnp
from jax.experimental import pallas as pl
from jax.experimental.pallas import tpu as pltpu

BN_EPS = 1e-5


def _head_kernel(alpha_ref, x_ref, w1_ref, b1_ref, gamma_ref, beta_ref,
                 w2_ref, b2_ref, out_ref, acc_ref, *, tk):
    k = pl.program_id(0)

    @pl.when(k == 0)
    def _init():
        acc_ref[...] = jnp.zeros_like(acc_ref)

    # Streamed Linear 1: accumulate (B, tk) @ (tk, MID) into the f32 scratch.
    # x is resident in VMEM; slice the current K-window out of it.
    if tk % 128 == 0:
        start = pl.multiple_of(k * tk, 128)
    else:
        start = k * tk
    x_blk = x_ref[:, pl.ds(start, tk)]
    acc_ref[...] += jnp.dot(x_blk, w1_ref[...],
                            preferred_element_type=jnp.float32)

    @pl.when(k == pl.num_programs(0) - 1)
    def _finalize():
        h = acc_ref[...] + b1_ref[...]                       # (B, MID) f32

        # PReLU with a single shared parameter (scalar from SMEM).
        alpha = alpha_ref[0, 0]
        h = jnp.where(h >= 0.0, h, alpha * h)

        # BatchNorm1d (training mode), two-pass batch statistics in f32.
        inv_n = 1.0 / h.shape[0]
        mean = jnp.sum(h, axis=0, keepdims=True) * inv_n     # (1, MID)
        centered = h - mean
        var = jnp.sum(centered * centered, axis=0, keepdims=True) * inv_n
        h = centered * jax.lax.rsqrt(var + BN_EPS)
        h = h * gamma_ref[...] + beta_ref[...]

        # Linear 2: (B, MID) @ (MID, OUT) + bias, bf16 MXU / f32 accumulate.
        y = jnp.dot(h.astype(w2_ref.dtype), w2_ref[...],
                    preferred_element_type=jnp.float32) + b2_ref[...]
        out_ref[...] = y.astype(out_ref.dtype)


def _pick_tk(in_chn, mid_chn, weight_itemsize=2, w1_budget_bytes=40 << 20):
    """Largest IN-reduction tile whose double-buffered (tk, MID) w1 block fits
    the budget.  Prefers tk == IN (single grid step)."""
    max_tk = max(128, w1_budget_bytes // (2 * mid_chn * weight_itemsize))
    if in_chn <= max_tk:
        return in_chn
    best = None
    t = 128
    while t <= max_tk:
        if in_chn % t == 0:
            best = t
        t += 128
    # Fallback: no divisor multiple of 128 found -> single step (may exceed
    # the nominal budget; only hit for unusual IN values).
    return best if best is not None else in_chn


def fully_connected_2layer_head(x_flat, params, *, weight_dtype=jnp.bfloat16):
    """x_flat: (B, IN) float32.  params: dict from init_params."""
    B, in_chn = x_flat.shape
    mid_chn = params["w1"].shape[1]
    out_chn = params["w2"].shape[1]

    itemsize = jnp.dtype(weight_dtype).itemsize
    tk = _pick_tk(in_chn, mid_chn, itemsize)
    grid = (in_chn // tk,)

    # bf16 weights/activations at the boundary; biases/BN params stay f32.
    x = x_flat.astype(weight_dtype)
    w1 = params["w1"].astype(weight_dtype)
    w2 = params["w2"].astype(weight_dtype)

    bytes_accessed = (x.size * itemsize + w1.size * itemsize + w2.size * itemsize
                      + (params["b1"].size + params["gamma"].size
                         + params["beta"].size + params["b2"].size) * 4
                      + params["alpha"].size * 4
                      + B * out_chn * 4)
    cost = pl.CostEstimate(
        flops=2 * B * (in_chn * mid_chn + mid_chn * out_chn),
        transcendentals=mid_chn,                     # the per-feature rsqrt
        bytes_accessed=bytes_accessed)

    # VMEM budget: actual residents + double-buffered w1 stream, with headroom,
    # capped at 48 MiB so it stays inside v7x's 64 MiB physical VMEM while still
    # allowing far bigger tiles than the old 32 MiB cap on v5e/v6e.
    vmem_needed = (2 * tk * mid_chn * itemsize       # double-buffered w1 block
                   + B * in_chn * itemsize           # resident x
                   + B * mid_chn * 4                 # f32 accumulator scratch
                   + mid_chn * out_chn * itemsize    # resident w2
                   + (3 * mid_chn + out_chn) * 4     # b1 / gamma / beta / b2
                   + 2 * B * out_chn * 4)            # output block (buffered)
    vmem_limit = min(48 << 20, max(16 << 20, 2 * vmem_needed))

    grid_spec = pltpu.PrefetchScalarGridSpec(
        num_scalar_prefetch=0,
        grid=grid,
        in_specs=[
            # PReLU alpha: a single scalar, keep it in SMEM.
            pl.BlockSpec(memory_space=pltpu.MemorySpace.SMEM),
            # x: tiny, fully resident in VMEM; sliced inside the kernel.
            pl.BlockSpec((B, in_chn), lambda k: (0, 0)),
            # w1 streamed over the IN reduction axis (double-buffered DMA).
            pl.BlockSpec((tk, mid_chn), lambda k: (k, 0)),
            # Small residents (bias / BN params / second-layer weights).
            pl.BlockSpec((1, mid_chn), lambda k: (0, 0)),        # b1
            pl.BlockSpec((1, mid_chn), lambda k: (0, 0)),        # gamma
            pl.BlockSpec((1, mid_chn), lambda k: (0, 0)),        # beta
            pl.BlockSpec((mid_chn, out_chn), lambda k: (0, 0)),  # w2
            pl.BlockSpec((1, out_chn), lambda k: (0, 0)),        # b2
        ],
        out_specs=pl.BlockSpec((B, out_chn), lambda k: (0, 0)),
        scratch_shapes=[pltpu.VMEM((B, mid_chn), jnp.float32)],
    )

    return pl.pallas_call(
        functools.partial(_head_kernel, tk=tk),
        out_shape=jax.ShapeDtypeStruct((B, out_chn), jnp.float32),
        grid_spec=grid_spec,
        compiler_params=pltpu.CompilerParams(
            dimension_semantics=("arbitrary",),      # IN axis is a reduction
            vmem_limit_bytes=int(vmem_limit),
        ),
        cost_estimate=cost,
    )(params["alpha"], x, w1,
      params["b1"], params["gamma"], params["beta"],
      w2, params["b2"])


def init_params(key, in_chn, out_chn, mid_chn=None):
    if mid_chn is None:
        mid_chn = in_chn // 2
    k1, k2, k3, k4 = jax.random.split(key, 4)
    # PyTorch-style uniform(-1/sqrt(fan_in), 1/sqrt(fan_in)) init, deterministic.
    lim1 = 1.0 / jnp.sqrt(in_chn)
    lim2 = 1.0 / jnp.sqrt(mid_chn)
    return {
        # weights stored transposed: (in, out)
        "w1": jax.random.uniform(k1, (in_chn, mid_chn), jnp.float32, -lim1, lim1),
        "b1": jax.random.uniform(k2, (1, mid_chn), jnp.float32, -lim1, lim1),
        "alpha": jnp.full((1, 1), 0.25, jnp.float32),      # PReLU default init
        "gamma": jnp.ones((1, mid_chn), jnp.float32),      # BN weight
        "beta": jnp.zeros((1, mid_chn), jnp.float32),      # BN bias
        "w2": jax.random.uniform(k3, (mid_chn, out_chn), jnp.float32, -lim2, lim2),
        "b2": jax.random.uniform(k4, (1, out_chn), jnp.float32, -lim2, lim2),
    }


def reference_forward(x_flat, p):
    # Pure-f32 reference matching the PyTorch module semantics (BN training mode).
    h = x_flat @ p["w1"] + p["b1"]
    h = jnp.where(h >= 0.0, h, p["alpha"] * h)
    mean = jnp.mean(h, axis=0, keepdims=True)
    var = jnp.mean((h - mean) ** 2, axis=0, keepdims=True)
    h = (h - mean) / jnp.sqrt(var + BN_EPS) * p["gamma"] + p["beta"]
    return h @ p["w2"] + p["b2"]


if __name__ == "__main__":
    key = jax.random.PRNGKey(0)
    kx, kp = jax.random.split(key)

    # Small shapes consistent with the module: NCHW input (2, 4, 16, 16).
    B, C, H, W = 2, 4, 16, 16
    in_chn = C * H * W          # 1024
    out_chn = 32                # head output dim
    x_nchw = jax.random.normal(kx, (B, C, H, W), jnp.float32)
    x_flat = x_nchw.reshape(B, -1)          # == torch flatten(start_dim=1)

    params = init_params(kp, in_chn, out_chn)

    y = fully_connected_2layer_head(x_flat, params)
    y = jax.block_until_ready(y)

    y_ref = reference_forward(x_flat, params)
    assert y.shape == (B, out_chn)
    # bf16 weights/activations with f32 accumulation vs pure-f32 reference:
    # relaxed tolerance (BN with batch size 2 amplifies tiny h deltas).
    assert jnp.allclose(y, y_ref, atol=5e-2, rtol=5e-2), "mismatch vs reference"

    print("KERNEL_OK")
</pallas_src>

<mosaic_0001>
module attributes {stable_mosaic.version = 11 : i64} {
  func.func @_head_kernel(%arg0: i32, %arg1: memref<1x1xf32, #tpu.memory_space<smem>>, %arg2: memref<2x1024xbf16, #tpu.memory_space<vmem>>, %arg3: memref<1024x512xbf16, #tpu.memory_space<vmem>>, %arg4: memref<1x512xf32, #tpu.memory_space<vmem>>, %arg5: memref<1x512xf32, #tpu.memory_space<vmem>>, %arg6: memref<1x512xf32, #tpu.memory_space<vmem>>, %arg7: memref<512x32xbf16, #tpu.memory_space<vmem>>, %arg8: memref<1x32xf32, #tpu.memory_space<vmem>>, %arg9: memref<2x32xf32, #tpu.memory_space<vmem>>, %arg10: memref<2x512xf32, #tpu.memory_space<vmem>>) attributes {dimension_semantics = [#tpu.dimension_semantics<arbitrary>], iteration_bounds = array<i64: 1>, scalar_prefetch = 0 : i64, scratch_operands = 1 : i64, tpu.core_type = #tpu.core_type<tc>, window_params = [{transform_indices = @transform_0, window_bounds = array<i64: 1, 1>}, {pipeline_mode = #tpu.pipeline_mode<synchronous>, transform_indices = @transform_1, window_bounds = array<i64: 2, 1024>}, {transform_indices = @transform_2, window_bounds = array<i64: 1024, 512>}, {pipeline_mode = #tpu.pipeline_mode<synchronous>, transform_indices = @transform_3, window_bounds = array<i64: 1, 512>}, {pipeline_mode = #tpu.pipeline_mode<synchronous>, transform_indices = @transform_4, window_bounds = array<i64: 1, 512>}, {pipeline_mode = #tpu.pipeline_mode<synchronous>, transform_indices = @transform_5, window_bounds = array<i64: 1, 512>}, {pipeline_mode = #tpu.pipeline_mode<synchronous>, transform_indices = @transform_6, window_bounds = array<i64: 512, 32>}, {pipeline_mode = #tpu.pipeline_mode<synchronous>, transform_indices = @transform_7, window_bounds = array<i64: 1, 32>}, {pipeline_mode = #tpu.pipeline_mode<synchronous>, transform_indices = @transform_8, window_bounds = array<i64: 2, 32>}]} {
    %c0_i32 = arith.constant 0 : i32
    %0 = arith.cmpi eq, %arg0, %c0_i32 : i32
    %1 = arith.extui %0 : i1 to i32
    %c0_i32_0 = arith.constant 0 : i32
    %2 = arith.cmpi ne, %1, %c0_i32_0 : i32
    scf.if %2 {
      %cst_9 = arith.constant 0.000000e+00 : f32
      %15 = vector.broadcast %cst_9 : f32 to vector<2x512xf32>
      %c0_10 = arith.constant 0 : index
      %c0_11 = arith.constant 0 : index
      %16 = vector.load %arg10[%c0_10, %c0_11] : memref<2x512xf32, #tpu.memory_space<vmem>>, vector<2x512xf32>
      tpu.vector_store %arg10[%c0_10, %c0_11], %15 {strides = array<i32>} : memref<2x512xf32, #tpu.memory_space<vmem>>, vector<2x512xf32>,
    } else {
    }
    %c1024_i32 = arith.constant 1024 : i32
    %3 = arith.muli %arg0, %c1024_i32 : i32
    %4 = tpu.assume_multiple %3, 128 : i32
    %c0 = arith.constant 0 : index
    %5 = arith.index_cast %4 : i32 to index
    %6 = vector.load %arg2[%c0, %5] : memref<2x1024xbf16, #tpu.memory_space<vmem>>, vector<2x1024xbf16>
    %c0_1 = arith.constant 0 : index
    %c0_2 = arith.constant 0 : index
    %7 = vector.load %arg10[%c0_1, %c0_2] : memref<2x512xf32, #tpu.memory_space<vmem>>, vector<2x512xf32>
    %c0_3 = arith.constant 0 : index
    %c0_4 = arith.constant 0 : index
    %8 = vector.load %arg3[%c0_3, %c0_4] : memref<1024x512xbf16, #tpu.memory_space<vmem>>, vector<1024x512xbf16>
    %cst = arith.constant dense<0.000000e+00> : vector<2x512xf32>
    %9 = tpu.matmul %6, %8, %cst {dimension_numbers = #tpu.dot_dimension_numbers<[1], [0], [0], [1], [0, 0, 1, 1], [], []>} : vector<2x1024xbf16>, vector<1024x512xbf16>, vector<2x512xf32> -> vector<2x512xf32>
    %10 = arith.addf %7, %9 : vector<2x512xf32>
    %c0_5 = arith.constant 0 : index
    %c0_6 = arith.constant 0 : index
    %11 = vector.load %arg10[%c0_5, %c0_6] : memref<2x512xf32, #tpu.memory_space<vmem>>, vector<2x512xf32>
    tpu.vector_store %arg10[%c0_5, %c0_6], %10 {strides = array<i32>} : memref<2x512xf32, #tpu.memory_space<vmem>>, vector<2x512xf32>,
    %c0_i32_7 = arith.constant 0 : i32
    %12 = arith.cmpi eq, %arg0, %c0_i32_7 : i32
    %13 = arith.extui %12 : i1 to i32
    %c0_i32_8 = arith.constant 0 : i32
    %14 = arith.cmpi ne, %13, %c0_i32_8 : i32
    scf.if %14 {
      %c0_9 = arith.constant 0 : index
      %c0_10 = arith.constant 0 : index
      %15 = vector.load %arg10[%c0_9, %c0_10] : memref<2x512xf32, #tpu.memory_space<vmem>>, vector<2x512xf32>
      %c0_11 = arith.constant 0 : index
      %c0_12 = arith.constant 0 : index
      %16 = vector.load %arg4[%c0_11, %c0_12] : memref<1x512xf32, #tpu.memory_space<vmem>>, vector<1x512xf32>
      %17 = vector.broadcast %16 : vector<1x512xf32> to vector<2x512xf32>
      %18 = arith.addf %15, %17 : vector<2x512xf32>
      %c0_13 = arith.constant 0 : index
      %c0_14 = arith.constant 0 : index
      %19 = memref.load %arg1[%c0_13, %c0_14] : memref<1x1xf32, #tpu.memory_space<smem>>
      %cst_15 = arith.constant 0.000000e+00 : f32
      %20 = vector.broadcast %cst_15 : f32 to vector<2x512xf32>
      %21 = arith.cmpf oge, %18, %20 : vector<2x512xf32>
      %22 = vector.broadcast %19 : f32 to vector<2x512xf32>
      %23 = arith.mulf %22, %18 : vector<2x512xf32>
      %24 = arith.select %21, %18, %23 : vector<2x512xi1>, vector<2x512xf32>
      %cst_16 = arith.constant dense<0.000000e+00> : vector<512xf32>
      %25 = vector.multi_reduction <add>, %24, %cst_16 [0] : vector<2x512xf32> to vector<512xf32>
      %26 = vector.shape_cast %25 : vector<512xf32> to vector<1x512xf32>
      %cst_17 = arith.constant 5.000000e-01 : f32
      %27 = vector.broadcast %cst_17 : f32 to vector<1x512xf32>
      %28 = arith.mulf %26, %27 : vector<1x512xf32>
      %29 = vector.broadcast %28 : vector<1x512xf32> to vector<2x512xf32>
      %30 = arith.subf %24, %29 : vector<2x512xf32>
      %31 = arith.mulf %30, %30 : vector<2x512xf32>
      %cst_18 = arith.constant dense<0.000000e+00> : vector<512xf32>
      %32 = vector.multi_reduction <add>, %31, %cst_18 [0] : vector<2x512xf32> to vector<512xf32>
      %33 = vector.shape_cast %32 : vector<512xf32> to vector<1x512xf32>
      %cst_19 = arith.constant 5.000000e-01 : f32
      %34 = vector.broadcast %cst_19 : f32 to vector<1x512xf32>
      %35 = arith.mulf %33, %34 : vector<1x512xf32>
      %cst_20 = arith.constant 9.99999974E-6 : f32
      %36 = vector.broadcast %cst_20 : f32 to vector<1x512xf32>
      %37 = arith.addf %35, %36 : vector<1x512xf32>
      %38 = math.rsqrt %37 : vector<1x512xf32>
      %39 = vector.broadcast %38 : vector<1x512xf32> to vector<2x512xf32>
      %40 = arith.mulf %30, %39 : vector<2x512xf32>
      %c0_21 = arith.constant 0 : index
      %c0_22 = arith.constant 0 : index
      %41 = vector.load %arg5[%c0_21, %c0_22] : memref<1x512xf32, #tpu.memory_space<vmem>>, vector<1x512xf32>
      %42 = vector.broadcast %41 : vector<1x512xf32> to vector<2x512xf32>
      %43 = arith.mulf %40, %42 : vector<2x512xf32>
      %c0_23 = arith.constant 0 : index
      %c0_24 = arith.constant 0 : index
      %44 = vector.load %arg6[%c0_23, %c0_24] : memref<1x512xf32, #tpu.memory_space<vmem>>, vector<1x512xf32>
      %45 = vector.broadcast %44 : vector<1x512xf32> to vector<2x512xf32>
      %46 = arith.addf %43, %45 : vector<2x512xf32>
      %47 = arith.truncf %46 : vector<2x512xf32> to vector<2x512xbf16>
      %c0_25 = arith.constant 0 : index
      %c0_26 = arith.constant 0 : index
      %48 = vector.load %arg7[%c0_25, %c0_26] : memref<512x32xbf16, #tpu.memory_space<vmem>>, vector<512x32xbf16>
      %cst_27 = arith.constant dense<0.000000e+00> : vector<2x32xf32>
      %49 = tpu.matmul %47, %48, %cst_27 {dimension_numbers = #tpu.dot_dimension_numbers<[1], [0], [0], [1], [0, 0, 1, 1], [], []>} : vector<2x512xbf16>, vector<512x32xbf16>, vector<2x32xf32> -> vector<2x32xf32>
      %c0_28 = arith.constant 0 : index
      %c0_29 = arith.constant 0 : index
      %50 = vector.load %arg8[%c0_28, %c0_29] : memref<1x32xf32, #tpu.memory_space<vmem>>, vector<1x32xf32>
      %51 = vector.broadcast %50 : vector<1x32xf32> to vector<2x32xf32>
      %52 = arith.addf %49, %51 : vector<2x32xf32>
      %c0_30 = arith.constant 0 : index
      %c0_31 = arith.constant 0 : index
      %53 = vector.load %arg9[%c0_30, %c0_31] : memref<2x32xf32, #tpu.memory_space<vmem>>, vector<2x32xf32>
      tpu.vector_store %arg9[%c0_30, %c0_31], %52 {strides = array<i32>} : memref<2x32xf32, #tpu.memory_space<vmem>>, vector<2x32xf32>,
    } else {
    }
    return
  }
  func.func @transform_0(%arg0: i32) -> (i32, i32) {
    %c0_i32 = arith.constant 0 : i32
    %c0_i32_0 = arith.constant 0 : i32
    %c0_i32_1 = arith.constant 0 : i32
    return %c0_i32, %c0_i32_0 : i32, i32
  }
  func.func @transform_1(%arg0: i32) -> (i32, i32) {
    %c0_i32 = arith.constant 0 : i32
    %c0_i32_0 = arith.constant 0 : i32
    %c0_i32_1 = arith.constant 0 : i32
    return %c0_i32, %c0_i32_0 : i32, i32
  }
  func.func @transform_2(%arg0: i32) -> (i32, i32) {
    %c0_i32 = arith.constant 0 : i32
    %c0_i32_0 = arith.constant 0 : i32
    return %arg0, %c0_i32 : i32, i32
  }
  func.func @transform_3(%arg0: i32) -> (i32, i32) {
    %c0_i32 = arith.constant 0 : i32
    %c0_i32_0 = arith.constant 0 : i32
    %c0_i32_1 = arith.constant 0 : i32
    return %c0_i32, %c0_i32_0 : i32, i32
  }
  func.func @transform_4(%arg0: i32) -> (i32, i32) {
    %c0_i32 = arith.constant 0 : i32
    %c0_i32_0 = arith.constant 0 : i32
    %c0_i32_1 = arith.constant 0 : i32
    return %c0_i32, %c0_i32_0 : i32, i32
  }
  func.func @transform_5(%arg0: i32) -> (i32, i32) {
    %c0_i32 = arith.constant 0 : i32
    %c0_i32_0 = arith.constant 0 : i32
    %c0_i32_1 = arith.constant 0 : i32
    return %c0_i32, %c0_i32_0 : i32, i32
  }
  func.func @transform_6(%arg0: i32) -> (i32, i32) {
    %c0_i32 = arith.constant 0 : i32
    %c0_i32_0 = arith.constant 0 : i32
    %c0_i32_1 = arith.constant 0 : i32
    return %c0_i32, %c0_i32_0 : i32, i32
  }
  func.func @transform_7(%arg0: i32) -> (i32, i32) {
    %c0_i32 = arith.constant 0 : i32
    %c0_i32_0 = arith.constant 0 : i32
    %c0_i32_1 = arith.constant 0 : i32
    return %c0_i32, %c0_i32_0 : i32, i32
  }
  func.func @transform_8(%arg0: i32) -> (i32, i32) {
    %c0_i32 = arith.constant 0 : i32
    %c0_i32_0 = arith.constant 0 : i32
    %c0_i32_1 = arith.constant 0 : i32
    return %c0_i32, %c0_i32_0 : i32, i32
  }
}

</mosaic_0001>

<bundles_post_ra>
// kernel: tpu_custom_call.1
= control target key start
LH: loop header
LB: loop body
LE: loop exit
PB: predicated region body
PF: predicated region fallthrough
CT: control target
= control target key end

     0   :  { %14 = vsyncpa [#allocation5], 0  ;;  %s3786_s0 = inlined_call_operand.<no memory space> [shape: f32[1,1], index: 0, kind: input, shape index: {}]   ;;  %s3787_s1 = inlined_call_operand.vmem [shape: bf16[2,1024], index: 1, kind: input, shape index: {}]   ;;  %s3788_s2 = inlined_call_operand.hbm [shape: bf16[1024,512], index: 2, kind: input, shape index: {}]   ;;  %s3789_s3 = inlined_call_operand.vmem [shape: f32[1,512], index: 3, kind: input, shape index: {}]   ;;  %s3790_s4 = inlined_call_operand.vmem [shape: f32[1,512], index: 4, kind: input, shape index: {}]   ;;  %s3791_s5 = inlined_call_operand.vmem [shape: f32[1,512], index: 5, kind: input, shape index: {}]   ;;  %s3792_s6 = inlined_call_operand.vmem [shape: bf16[512,32], index: 6, kind: input, shape index: {}]   ;;  %s3793_s7 = inlined_call_operand.vmem [shape: f32[1,32], index: 7, kind: input, shape index: {}]   ;;  %s3794_s8 = inlined_call_operand.hbm [shape: f32[2,32], index: 8, kind: output, shape index: {}]  }
   0x1   :  { %15 = vsyncpa [#allocation6], 0  ;;  %s3510_s27 = smov [#allocation4]   ;;  %s3462_s9 = scalar_lea.hbm %s3788_s2, 32768 }
   0x2   :  { %s25_s28 = sshll.u32 %s3510_s27, 4  ;;  %p3463_p0 = scmp.ne.s32.totalorder %s3788_s2, %s3462_s9  ;;  %s26_s28 = int_to_ptr.vmem [resolvable:$true] %s25_s28 }
   0x3   :  { %p3466_p1 = scmp.lt.u32.totalorder %s3462_s9, %s3788_s2 }
   0x5   :  { %p3468_p2 = pnand %p3466_p1, %p3463_p0 }
   0x7   :  { %3471 = shalt.err (!%p3468_p2)
}
   0x8   :  { %s3472_s14 = scalar_lea.vmem %s26_s28, 32768  ;;  %p3477_p4 = scmp.lt.s32.totalorder %s26_s28, %s26_s28 }
   0x9   :  { %p3473_p3 = scmp.ne.s32.totalorder %s26_s28, %s3472_s14  ;;  %p3478_p5 = scmp.lt.s32.totalorder %s3472_s14, %s3472_s14 }
   0xb   :  { %p3479_p6 = por %p3478_p5, %p3477_p4 }
   0xd   :  { %p3480_p7 = pnand %p3479_p6, %p3473_p3 }
   0xf   :  { %3483 = shalt.err (!%p3480_p7)
}
  0x10   :  { %s3511_s15 = smov 256   ;;  %s3512_s16 = smov 16  }
  0x11   :  { %31 = dma.hbm_to_vmem [thread:$0]  %s3788_s2, 32768, %s26_s28, [#allocation5], %s3511_s15, %s3511_s15, %s3512_s16  }
  0x12   :  { %3506 = dma.done.wait [#allocation5], 32768  }
  0x13   :  { %3507 = vsyncadd [#allocation5], 4294934528  ;;  %v3037_v0 = vld [vmem:[#allocation4 + $0x4] ss:$16 sps:$4 sm:$0xff]   ;;  %v3039_v1 = vld [vmem:[#allocation4 + $0xc] ss:$16 sps:$4 sm:$0xff]   ;;  %v318_v38 = vlaneseq }
  0x14   :  { %1651 = vmatprep.subr.bf16.mxu0 %v3037_v0  ;;  %v3041_v2 = vld [vmem:[#allocation4] ss:$16 sps:$4 sm:$0xff]   ;;  %v3042_v3 = vld [vmem:[#allocation4 + $0x8] ss:$16 sps:$4 sm:$0xff]   ;;  %1815 = vmatprep.subr.bf16.mxu1 %v3039_v1  ;;  %v3043_v4 = vld [vmem:[#allocation4 + $0x24] ss:$16 sps:$4 sm:$0xff]  }
  0x15   :  { %1652 = vmatpush1.bf16.msra.mxu0 %v3041_v2  ;;  %1816 = vmatpush1.bf16.msra.mxu1 %v3042_v3  ;;  %v3045_v5 = vld [vmem:[#allocation4 + $0x2c] ss:$16 sps:$4 sm:$0xff]   ;;  %v3047_v6 = vld [vmem:[#allocation4 + $0x20] ss:$16 sps:$4 sm:$0xff]   ;;  %v3048_v7 = vld [vmem:[#allocation4 + $0x28] ss:$16 sps:$4 sm:$0xff]  }
  0x16   :  { %1653 = vmatprep.subr.bf16.mxu0 %v3043_v4  ;;  %1817 = vmatprep.subr.bf16.mxu1 %v3045_v5  ;;  %v3049_v8 = vld [vmem:[#allocation4 + $0x44] ss:$16 sps:$4 sm:$0xff]   ;;  %v3051_v9 = vld [vmem:[#allocation4 + $0x4c] ss:$16 sps:$4 sm:$0xff]   ;;  %v3053_v10 = vld [vmem:[#allocation4 + $0x40] ss:$16 sps:$4 sm:$0xff]  }
  0x17   :  { %v3054_v11 = vld [vmem:[#allocation4 + $0x48] ss:$16 sps:$4 sm:$0xff]   ;;  %v3055_v12 = vld [vmem:[#allocation4 + $0x64] ss:$16 sps:$4 sm:$0xff]   ;;  %v3057_v13 = vld [vmem:[#allocation4 + $0x6c] ss:$16 sps:$4 sm:$0xff]  }
  0x18   :  { %v3059_v14 = vld [vmem:[#allocation4 + $0x60] ss:$16 sps:$4 sm:$0xff]   ;;  %v3060_v15 = vld [vmem:[#allocation4 + $0x68] ss:$16 sps:$4 sm:$0xff]   ;;  %v3061_v16 = vld [vmem:[#allocation4 + $0x84] ss:$16 sps:$4 sm:$0xff]  }
  0x19   :  { %1654 = vmatpush1.bf16.msra.mxu0 %v3047_v6  ;;  %1818 = vmatpush1.bf16.msra.mxu1 %v3048_v7  ;;  %v3063_v17 = vld [vmem:[#allocation4 + $0x8c] ss:$16 sps:$4 sm:$0xff]   ;;  %v3065_v18 = vld [vmem:[#allocation4 + $0x80] ss:$16 sps:$4 sm:$0xff]   ;;  %v3066_v19 = vld [vmem:[#allocation4 + $0x88] ss:$16 sps:$4 sm:$0xff]  }
  0x1a   :  { %1655 = vmatprep.subr.bf16.mxu0 %v3049_v8  ;;  %1819 = vmatprep.subr.bf16.mxu1 %v3051_v9  ;;  %v3067_v20 = vld [vmem:[#allocation4 + $0xa4] ss:$16 sps:$4 sm:$0xff]   ;;  %v3069_v21 = vld [vmem:[#allocation4 + $0xac] ss:$16 sps:$4 sm:$0xff]   ;;  %v3071_v22 = vld [vmem:[#allocation4 + $0xa0] ss:$16 sps:$4 sm:$0xff]  }
  0x1b   :  { %v3072_v23 = vld [vmem:[#allocation4 + $0xa8] ss:$16 sps:$4 sm:$0xff]   ;;  %v3073_v24 = vld [vmem:[#allocation4 + $0xc4] ss:$16 sps:$4 sm:$0xff]   ;;  %v3075_v25 = vld [vmem:[#allocation4 + $0xcc] ss:$16 sps:$4 sm:$0xff]  }
  0x1c   :  { %v3077_v26 = vld [vmem:[#allocation4 + $0xc0] ss:$16 sps:$4 sm:$0xff]   ;;  %v3078_v27 = vld [vmem:[#allocation4 + $0xc8] ss:$16 sps:$4 sm:$0xff]   ;;  %v3079_v28 = vld [vmem:[#allocation4 + $0xe4] ss:$16 sps:$4 sm:$0xff]  }
  0x1d   :  { %1656 = vmatpush1.bf16.msra.mxu0 %v3053_v10  ;;  %1820 = vmatpush1.bf16.msra.mxu1 %v3054_v11  ;;  %v3081_v29 = vld [vmem:[#allocation4 + $0xec] ss:$16 sps:$4 sm:$0xff]   ;;  %v3083_v30 = vld [vmem:[#allocation4 + $0xe0] ss:$16 sps:$4 sm:$0xff]   ;;  %v3084_v31 = vld [vmem:[#allocation4 + $0xe8] ss:$16 sps:$4 sm:$0xff]  }
  0x1e   :  { %1657 = vmatprep.subr.bf16.mxu0 %v3055_v12  ;;  %1821 = vmatprep.subr.bf16.mxu1 %v3057_v13  ;;  %v3085_v32 = vld [vmem:[#allocation4 + $0x104] ss:$16 sps:$4 sm:$0xff]   ;;  %v3087_v33 = vld [vmem:[#allocation4 + $0x10c] ss:$16 sps:$4 sm:$0xff]   ;;  %v3089_v34 = vld [vmem:[#allocation4 + $0x100] ss:$16 sps:$4 sm:$0xff]  }
  0x1f   :  { %v3090_v35 = vld [vmem:[#allocation4 + $0x108] ss:$16 sps:$4 sm:$0xff]   ;;  %v3513_v36 = vmov 1966171168   ;;  %v3091_v39 = vld [vmem:[#allocation4 + $0x124] ss:$16 sps:$4 sm:$0xff]  }
  0x20   :  { %v316_v37 = vunpack.c.l.s4 %v3513_v36  ;;  %v3093_v40 = vld [vmem:[#allocation4 + $0x12c] ss:$16 sps:$4 sm:$0xff]   ;;  %v3095_v41 = vld [vmem:[#allocation4 + $0x120] ss:$16 sps:$4 sm:$0xff]   ;;  %v3573_v43 = vshrl.u32 %v318_v38, 7  ;;  %vm2071_vm1 = vcmask 1041408  }
  0x21   :  { %1658 = vmatpush1.bf16.msra.mxu0 %v3059_v14  ;;  %1822 = vmatpush1.bf16.msra.mxu1 %v3060_v15  ;;  %v3096_v44 = vld [vmem:[#allocation4 + $0x128] ss:$16 sps:$4 sm:$0xff]   ;;  %v3097_v45 = vld [vmem:[#allocation4 + $0x144] ss:$16 sps:$4 sm:$0xff]   ;;  %v3099_v46 = vld [vmem:[#allocation4 + $0x14c] ss:$16 sps:$4 sm:$0xff]  }
  0x22   :  { %1659 = vmatprep.subr.bf16.mxu0 %v3061_v16  ;;  %1823 = vmatprep.subr.bf16.mxu1 %v3063_v17  ;;  %v317_v42 = vunpack.c.0.s8 %v316_v37  ;;  %v3101_v47 = vld [vmem:[#allocation4 + $0x140] ss:$16 sps:$4 sm:$0xff]   ;;  %v3102_v48 = vld [vmem:[#allocation4 + $0x148] ss:$16 sps:$4 sm:$0xff]   ;;  %v3103_v50 = vld [vmem:[#allocation4 + $0x164] ss:$16 sps:$4 sm:$0xff]  }
  0x23   :  { %v3105_v51 = vld [vmem:[#allocation4 + $0x16c] ss:$16 sps:$4 sm:$0xff]   ;;  %v55_v52 = vld [vmem:[%s3787_s1] sm:$0xff]  ;;  %v3108_v55 = vld [vmem:[#allocation4 + $0x168] ss:$16 sps:$4 sm:$0xff]   ;;  %s3515_s18 = smov [#allocation7]  }
  0x24   :  { %v3576_v49 = vsub.s32 %v317_v42, %v3573_v43  ;;  %v3107_v53 = vld [vmem:[#allocation4 + $0x160] ss:$16 sps:$4 sm:$0xff]   ;;  %v3109_v56 = vld [vmem:[#allocation4 + $0x184] ss:$16 sps:$4 sm:$0xff]   ;;  %v3111_v57 = vld [vmem:[#allocation4 + $0x18c] ss:$16 sps:$4 sm:$0xff]   ;;  %v314_v9 = vcombine.high %v55_v52, %v55_v52 }
  0x25   :  { %1660 = vmatpush1.bf16.msra.mxu0 %v3065_v18  ;;  %1824 = vmatpush1.bf16.msra.mxu1 %v3066_v19  ;;  %v3113_v59 = vld [vmem:[#allocation4 + $0x180] ss:$16 sps:$4 sm:$0xff]   ;;  %v3114_v61 = vld [vmem:[#allocation4 + $0x188] ss:$16 sps:$4 sm:$0xff]   ;;  %v3115_v62 = vld [vmem:[#allocation4 + $0x1a4] ss:$16 sps:$4 sm:$0xff]  }
  0x26   :  { %1661 = vmatprep.subr.bf16.mxu0 %v3067_v20  ;;  %1825 = vmatprep.subr.bf16.mxu1 %v3069_v21  ;;  %v321_v54 = vrot.slane %v55_v52, %v3576_v49  ;;  %v3117_v63 = vld [vmem:[#allocation4 + $0x1ac] ss:$16 sps:$4 sm:$0xff]   ;;  %v3119_v0 = vld [vmem:[#allocation4 + $0x1a0] ss:$16 sps:$4 sm:$0xff]   ;;  %v3120_v1 = vld [vmem:[#allocation4 + $0x1a8] ss:$16 sps:$4 sm:$0xff]   ;;  %v328_v13 = vrot.slane %v314_v9, %v3576_v49 }
  0x27   :  { %v3121_v2 = vld [vmem:[#allocation4 + $0x1c4] ss:$16 sps:$4 sm:$0xff]   ;;  %v3123_v3 = vld [vmem:[#allocation4 + $0x1cc] ss:$16 sps:$4 sm:$0xff]   ;;  %v3125_v4 = vld [vmem:[#allocation4 + $0x1c0] ss:$16 sps:$4 sm:$0xff]  }
  0x28   :  { %v329_v58 = vcombine.high %v321_v54, %v321_v54  ;;  %v3126_v5 = vld [vmem:[#allocation4 + $0x1c8] ss:$16 sps:$4 sm:$0xff]   ;;  %v3127_v6 = vld [vmem:[#allocation4 + $0x1e4] ss:$16 sps:$4 sm:$0xff]   ;;  %v3129_v7 = vld [vmem:[#allocation4 + $0x1ec] ss:$16 sps:$4 sm:$0xff]   ;;  %v3585_v15 = vrot.slane %v321_v54, %v3576_v49  ;;  %v330_v16 = vcombine.high %v328_v13, %v328_v13  ;;  %v3591_v21 = vrot.slane %v328_v13, %v3576_v49 }
  0x29   :  { %1662 = vmatpush1.bf16.msra.mxu0 %v3071_v22  ;;  %1826 = vmatpush1.bf16.msra.mxu1 %v3072_v23  ;;  %v3131_v8 = vld [vmem:[#allocation4 + $0x1e0] ss:$16 sps:$4 sm:$0xff]   ;;  %v3132_v10 = vld [vmem:[#allocation4 + $0x1e8] ss:$16 sps:$4 sm:$0xff]   ;;  %v3135_v11 = vld [vmem:[#allocation4 + $0x204] ss:$16 sps:$4 sm:$0xff]  }
  0x2a   :  { %1663 = vmatprep.subr.bf16.mxu0 %v3073_v24  ;;  %1827 = vmatprep.subr.bf16.mxu1 %v3075_v25  ;;  %v351_v60 = vrot.slane %v329_v58, %v3576_v49  ;;  %v3138_v12 = vld [vmem:[#allocation4 + $0x20c] ss:$16 sps:$4 sm:$0xff]   ;;  %v3133_v14 = vld [vmem:[#allocation4 + $0x200] ss:$16 sps:$4 sm:$0xff]   ;;  %v3136_v17 = vld [vmem:[#allocation4 + $0x208] ss:$16 sps:$4 sm:$0xff]   ;;  %v3588_v20 = vrot.slane %v330_v16, %v3576_v49 }
  0x2b   :  { %v3141_v18 = vld [vmem:[#allocation4 + $0x224] ss:$16 sps:$4 sm:$0xff]   ;;  %v3144_v19 = vld [vmem:[#allocation4 + $0x22c] ss:$16 sps:$4 sm:$0xff]   ;;  %v3139_v23 = vld [vmem:[#allocation4 + $0x220] ss:$16 sps:$4 sm:$0xff]  }
  0x2c   :  { %1683 = vmatprep.mubr.bf16.mxu0 %v351_v60  ;;  %1847 = vmatprep.mubr.bf16.mxu1 %v351_v60  ;;  %v361_v22 = vcombine.high %v351_v60, %v351_v60  ;;  %v3142_v24 = vld [vmem:[#allocation4 + $0x228] ss:$16 sps:$4 sm:$0xff]   ;;  %v3147_v25 = vld [vmem:[#allocation4 + $0x244] ss:$16 sps:$4 sm:$0xff]   ;;  %v3168_v38 = vld [vmem:[#allocation4 + $0x2ac] ss:$16 sps:$4 sm:$0xff]  }
  0x2d   :  { %1664 = vmatpush1.bf16.msra.mxu0 %v3077_v26  ;;  %1828 = vmatpush1.bf16.msra.mxu1 %v3078_v27  ;;  %v3150_v26 = vld [vmem:[#allocation4 + $0x24c] ss:$16 sps:$4 sm:$0xff]   ;;  %v3145_v27 = vld [vmem:[#allocation4 + $0x240] ss:$16 sps:$4 sm:$0xff]   ;;  %v3160_v36 = vld [vmem:[#allocation4 + $0x288] ss:$16 sps:$4 sm:$0xff]  }
  0x2e   :  { %1665 = vmatprep.subr.bf16.mxu0 %v3079_v28  ;;  %1829 = vmatprep.subr.bf16.mxu1 %v3081_v29  ;;  %v3148_v28 = vld [vmem:[#allocation4 + $0x248] ss:$16 sps:$4 sm:$0xff]   ;;  %v3153_v29 = vld [vmem:[#allocation4 + $0x264] ss:$16 sps:$4 sm:$0xff]   ;;  %v3174_v42 = vld [vmem:[#allocation4 + $0x2cc] ss:$16 sps:$4 sm:$0xff]  }
  0x2f   :  { %v3165_v37 = vld [vmem:[#allocation4 + $0x2a4] ss:$16 sps:$4 sm:$0xff]   ;;  %v3178_v49 = vld [vmem:[#allocation4 + $0x2e8] ss:$16 sps:$4 sm:$0xff]   ;;  %v3181_v52 = vld [vmem:[#allocation4 + $0x300] ss:$16 sps:$4 sm:$0xff]  }
  0x30   :  { %v3189_v54 = vld [vmem:[#allocation4 + $0x324] ss:$16 sps:$4 sm:$0xff]   ;;  %v3193_v60 = vld [vmem:[#allocation4 + $0x340] ss:$16 sps:$4 sm:$0xff]   ;;  %v3214_v9 = vld [vmem:[#allocation4 + $0x3a8] ss:$16 sps:$4 sm:$0xff]  }
  0x31   :  { %1666 = vmatpush1.bf16.msra.mxu0 %v3083_v30  ;;  %1830 = vmatpush1.bf16.msra.mxu1 %v3084_v31  ;;  %v3156_v30 = vld [vmem:[#allocation4 + $0x26c] ss:$16 sps:$4 sm:$0xff]   ;;  %v3151_v31 = vld [vmem:[#allocation4 + $0x260] ss:$16 sps:$4 sm:$0xff]   ;;  %v3195_v58 = vld [vmem:[#allocation4 + $0x344] ss:$16 sps:$4 sm:$0xff]  }
  0x32   :  { %1667 = vmatprep.subr.bf16.mxu0 %v3085_v32  ;;  %1831 = vmatprep.subr.bf16.mxu1 %v3087_v33  ;;  %v3154_v32 = vld [vmem:[#allocation4 + $0x268] ss:$16 sps:$4 sm:$0xff]   ;;  %v3159_v33 = vld [vmem:[#allocation4 + $0x284] ss:$16 sps:$4 sm:$0xff]   ;;  %v3228_v16 = vld [vmem:[#allocation4 + $0x3ec] ss:$16 sps:$4 sm:$0xff]  }
  0x33   :  { %v3220_v13 = vld [vmem:[#allocation4 + $0x3c8] ss:$16 sps:$4 sm:$0xff]   ;;  %s2664_s2 = sshll.u32 %s3515_s18, 4  ;;  %vm2656_vm2 = vcmask 254976   ;;  %s2665_s2 = int_to_ptr.vmem [resolvable:$true] %s2664_s2 }
  0x34   :  { %s3484_s19 = scalar_lea.vmem %s2665_s2, 32  ;;  %p3489_p9 = scmp.lt.s32.totalorder %s2665_s2, %s2665_s2 }
  0x35   :  { %1668 = vmatpush1.bf16.msra.mxu0 %v3089_v34  ;;  %1832 = vmatpush1.bf16.msra.mxu1 %v3090_v35  ;;  %v3162_v34 = vld [vmem:[#allocation4 + $0x28c] ss:$16 sps:$4 sm:$0xff]   ;;  %v3157_v35 = vld [vmem:[#allocation4 + $0x280] ss:$16 sps:$4 sm:$0xff]   ;;  %p3485_p8 = scmp.ne.s32.totalorder %s2665_s2, %s3484_s19  ;;  %p3490_p10 = scmp.lt.s32.totalorder %s3484_s19, %s3484_s19 }
  0x36   :  { %1669 = vmatprep.subr.bf16.mxu0 %v3091_v39  ;;  %1833 = vmatprep.subr.bf16.mxu1 %v3093_v40  ;;  %v3163_v39 = vld [vmem:[#allocation4 + $0x2a0] ss:$16 sps:$4 sm:$0xff]   ;;  %v3166_v40 = vld [vmem:[#allocation4 + $0x2a8] ss:$16 sps:$4 sm:$0xff]  }
  0x37   :  { %p3491_p11 = por %p3490_p10, %p3489_p9 }
  0x39   :  { %1670 = vmatpush1.bf16.msra.mxu0 %v3095_v41  ;;  %1834 = vmatpush1.bf16.msra.mxu1 %v3096_v44  ;;  %v3171_v41 = vld [vmem:[#allocation4 + $0x2c4] ss:$16 sps:$4 sm:$0xff]   ;;  %v3169_v44 = vld [vmem:[#allocation4 + $0x2c0] ss:$16 sps:$4 sm:$0xff]   ;;  %p3492_p12 = pnand %p3491_p11, %p3485_p8 }
  0x3a   :  { %1671 = vmatprep.subr.bf16.mxu0 %v3097_v45  ;;  %1835 = vmatprep.subr.bf16.mxu1 %v3099_v46  ;;  %v3172_v45 = vld [vmem:[#allocation4 + $0x2c8] ss:$16 sps:$4 sm:$0xff]   ;;  %v3177_v46 = vld [vmem:[#allocation4 + $0x2e4] ss:$16 sps:$4 sm:$0xff]  }
  0x3d   :  { %1672 = vmatpush1.bf16.msra.mxu0 %v3101_v47  ;;  %1836 = vmatpush1.bf16.msra.mxu1 %v3102_v48  ;;  %v3180_v47 = vld [vmem:[#allocation4 + $0x2ec] ss:$16 sps:$4 sm:$0xff]   ;;  %v3175_v48 = vld [vmem:[#allocation4 + $0x2e0] ss:$16 sps:$4 sm:$0xff]  }
  0x3e   :  { %1673 = vmatprep.subr.bf16.mxu0 %v3103_v50  ;;  %1837 = vmatprep.subr.bf16.mxu1 %v3105_v51  ;;  %v3183_v50 = vld [vmem:[#allocation4 + $0x304] ss:$16 sps:$4 sm:$0xff]   ;;  %v3186_v51 = vld [vmem:[#allocation4 + $0x30c] ss:$16 sps:$4 sm:$0xff]  }
  0x41   :  { %1674 = vmatpush1.bf16.msra.mxu0 %v3107_v53  ;;  %1838 = vmatpush1.bf16.msra.mxu1 %v3108_v55  ;;  %v3184_v53 = vld [vmem:[#allocation4 + $0x308] ss:$16 sps:$4 sm:$0xff]   ;;  %v3192_v55 = vld [vmem:[#allocation4 + $0x32c] ss:$16 sps:$4 sm:$0xff]  }
  0x42   :  { %1675 = vmatprep.subr.bf16.mxu0 %v3109_v56  ;;  %1839 = vmatprep.subr.bf16.mxu1 %v3111_v57  ;;  %v3187_v56 = vld [vmem:[#allocation4 + $0x320] ss:$16 sps:$4 sm:$0xff]   ;;  %v3190_v57 = vld [vmem:[#allocation4 + $0x328] ss:$16 sps:$4 sm:$0xff]  }
  0x45   :  { %1676 = vmatpush1.bf16.msra.mxu0 %v3113_v59  ;;  %1840 = vmatpush1.bf16.msra.mxu1 %v3114_v61  ;;  %v3198_v59 = vld [vmem:[#allocation4 + $0x34c] ss:$16 sps:$4 sm:$0xff]   ;;  %v3196_v61 = vld [vmem:[#allocation4 + $0x348] ss:$16 sps:$4 sm:$0xff]  }
  0x46   :  { %1677 = vmatprep.subr.bf16.mxu0 %v3115_v62  ;;  %1841 = vmatprep.subr.bf16.mxu1 %v3117_v63  ;;  %v3201_v62 = vld [vmem:[#allocation4 + $0x364] ss:$16 sps:$4 sm:$0xff]   ;;  %v3204_v63 = vld [vmem:[#allocation4 + $0x36c] ss:$16 sps:$4 sm:$0xff]  }
  0x49   :  { %1678 = vmatpush1.bf16.msra.mxu0 %v3119_v0  ;;  %1842 = vmatpush1.bf16.msra.mxu1 %v3120_v1  ;;  %v3199_v0 = vld [vmem:[#allocation4 + $0x360] ss:$16 sps:$4 sm:$0xff]   ;;  %v3202_v1 = vld [vmem:[#allocation4 + $0x368] ss:$16 sps:$4 sm:$0xff]  }
  0x4a   :  { %1679 = vmatprep.subr.bf16.mxu0 %v3121_v2  ;;  %1843 = vmatprep.subr.bf16.mxu1 %v3123_v3  ;;  %v3207_v2 = vld [vmem:[#allocation4 + $0x384] ss:$16 sps:$4 sm:$0xff]   ;;  %v3210_v3 = vld [vmem:[#allocation4 + $0x38c] ss:$16 sps:$4 sm:$0xff]  }
  0x4d   :  { %1680 = vmatpush1.bf16.msra.mxu0 %v3125_v4  ;;  %1844 = vmatpush1.bf16.msra.mxu1 %v3126_v5  ;;  %v3205_v4 = vld [vmem:[#allocation4 + $0x380] ss:$16 sps:$4 sm:$0xff]   ;;  %v3208_v5 = vld [vmem:[#allocation4 + $0x388] ss:$16 sps:$4 sm:$0xff]  }
  0x4e   :  { %1681 = vmatprep.subr.bf16.mxu0 %v3127_v6  ;;  %1845 = vmatprep.subr.bf16.mxu1 %v3129_v7  ;;  %v3213_v6 = vld [vmem:[#allocation4 + $0x3a4] ss:$16 sps:$4 sm:$0xff]   ;;  %v3216_v7 = vld [vmem:[#allocation4 + $0x3ac] ss:$16 sps:$4 sm:$0xff]  }
  0x51   :  { %1682 = vmatpush1.bf16.msra.mxu0 %v3131_v8  ;;  %1846 = vmatpush1.bf16.msra.mxu1 %v3132_v10  ;;  %v3211_v8 = vld [vmem:[#allocation4 + $0x3a0] ss:$16 sps:$4 sm:$0xff]   ;;  %v3219_v10 = vld [vmem:[#allocation4 + $0x3c4] ss:$16 sps:$4 sm:$0xff]  }
  0x52   :  { %1692 = vmatprep.subr.bf16.mxu0 %v3135_v11  ;;  %1856 = vmatprep.subr.bf16.mxu1 %v3138_v12  ;;  %v3222_v11 = vld [vmem:[#allocation4 + $0x3cc] ss:$16 sps:$4 sm:$0xff]   ;;  %v3217_v12 = vld [vmem:[#allocation4 + $0x3c0] ss:$16 sps:$4 sm:$0xff]  }
  0x54   :  { %1684 = vmatmul.mubr.bf16.vlgmr.msra.gmra.mrb[0].mxu0 %v3585_v15  ;;  %1848 = vmatmul.mubr.bf16.vlgmr.msra.gmra.mrb[0].mxu1 %v3585_v15 }
  0x55   :  { %1693 = vmatpush1.bf16.msra.mxu0 %v3133_v14  ;;  %1857 = vmatpush1.bf16.msra.mxu1 %v3136_v17  ;;  %v3225_v14 = vld [vmem:[#allocation4 + $0x3e4] ss:$16 sps:$4 sm:$0xff]   ;;  %v3223_v17 = vld [vmem:[#allocation4 + $0x3e0] ss:$16 sps:$4 sm:$0xff]  }
  0x56   :  { %1694 = vmatprep.subr.bf16.mxu0 %v3141_v18  ;;  %1858 = vmatprep.subr.bf16.mxu1 %v3144_v19  ;;  %v3226_v18 = vld [vmem:[#allocation4 + $0x3e8] ss:$16 sps:$4 sm:$0xff]   ;;  %v3231_v19 = vld [vmem:[#allocation4 + $0x404] ss:$16 sps:$4 sm:$0xff]  }
  0x57   :  { %1724 = vmatprep.mubr.bf16.mxu0 %v361_v22  ;;  %1888 = vmatprep.mubr.bf16.mxu1 %v361_v22  ;;  %v3234_v22 = vld [vmem:[#allocation4 + $0x40c] ss:$16 sps:$4 sm:$0xff]  }
  0x59   :  { %1695 = vmatpush1.bf16.msra.mxu0 %v3139_v23  ;;  %1859 = vmatpush1.bf16.msra.mxu1 %v3142_v24  ;;  %v3229_v23 = vld [vmem:[#allocation4 + $0x400] ss:$16 sps:$4 sm:$0xff]   ;;  %v359_v24 = vcombine.high %v3585_v15, %v3585_v15 }
  0x5a   :  { %1696 = vmatprep.subr.bf16.mxu0 %v3147_v25  ;;  %1860 = vmatprep.subr.bf16.mxu1 %v3150_v26  ;;  %v3232_v25 = vld [vmem:[#allocation4 + $0x408] ss:$16 sps:$4 sm:$0xff]   ;;  %v3237_v26 = vld [vmem:[#allocation4 + $0x424] ss:$16 sps:$4 sm:$0xff]   ;;  %v3241_v15 = vld [vmem:[#allocation4 + $0x440] ss:$16 sps:$4 sm:$0xff]  }
  0x5d   :  { %1697 = vmatpush1.bf16.msra.mxu0 %v3145_v27  ;;  %1861 = vmatpush1.bf16.msra.mxu1 %v3148_v28  ;;  %v3240_v27 = vld [vmem:[#allocation4 + $0x42c] ss:$16 sps:$4 sm:$0xff]   ;;  %v3235_v28 = vld [vmem:[#allocation4 + $0x420] ss:$16 sps:$4 sm:$0xff]  }
  0x5e   :  { %1698 = vmatprep.subr.bf16.mxu0 %v3153_v29  ;;  %1862 = vmatprep.subr.bf16.mxu1 %v3156_v30  ;;  %v3238_v29 = vld [vmem:[#allocation4 + $0x428] ss:$16 sps:$4 sm:$0xff]   ;;  %v3243_v30 = vld [vmem:[#allocation4 + $0x444] ss:$16 sps:$4 sm:$0xff]  }
  0x61   :  { %1699 = vmatpush1.bf16.msra.mxu0 %v3151_v31  ;;  %1863 = vmatpush1.bf16.msra.mxu1 %v3154_v32  ;;  %v3246_v31 = vld [vmem:[#allocation4 + $0x44c] ss:$16 sps:$4 sm:$0xff]   ;;  %v3244_v32 = vld [vmem:[#allocation4 + $0x448] ss:$16 sps:$4 sm:$0xff]  }
  0x62   :  { %1700 = vmatprep.subr.bf16.mxu0 %v3159_v33  ;;  %1864 = vmatprep.subr.bf16.mxu1 %v3162_v34  ;;  %v3249_v33 = vld [vmem:[#allocation4 + $0x464] ss:$16 sps:$4 sm:$0xff]   ;;  %v3252_v34 = vld [vmem:[#allocation4 + $0x46c] ss:$16 sps:$4 sm:$0xff]  }
  0x65   :  { %1701 = vmatpush1.bf16.msra.mxu0 %v3157_v35  ;;  %1865 = vmatpush1.bf16.msra.mxu1 %v3160_v36  ;;  %v3247_v35 = vld [vmem:[#allocation4 + $0x460] ss:$16 sps:$4 sm:$0xff]   ;;  %v3250_v36 = vld [vmem:[#allocation4 + $0x468] ss:$16 sps:$4 sm:$0xff]  }
  0x66   :  { %1702 = vmatprep.subr.bf16.mxu0 %v3165_v37  ;;  %1866 = vmatprep.subr.bf16.mxu1 %v3168_v38  ;;  %v3255_v37 = vld [vmem:[#allocation4 + $0x484] ss:$16 sps:$4 sm:$0xff]   ;;  %v3258_v38 = vld [vmem:[#allocation4 + $0x48c] ss:$16 sps:$4 sm:$0xff]  }
  0x69   :  { %1703 = vmatpush1.bf16.msra.mxu0 %v3163_v39  ;;  %1867 = vmatpush1.bf16.msra.mxu1 %v3166_v40  ;;  %v3253_v39 = vld [vmem:[#allocation4 + $0x480] ss:$16 sps:$4 sm:$0xff]   ;;  %v3256_v40 = vld [vmem:[#allocation4 + $0x488] ss:$16 sps:$4 sm:$0xff]  }
  0x6a   :  { %1704 = vmatprep.subr.bf16.mxu0 %v3171_v41  ;;  %1868 = vmatprep.subr.bf16.mxu1 %v3174_v42  ;;  %v3261_v41 = vld [vmem:[#allocation4 + $0x4a4] ss:$16 sps:$4 sm:$0xff]   ;;  %v3264_v42 = vld [vmem:[#allocation4 + $0x4ac] ss:$16 sps:$4 sm:$0xff]  }
  0x6d   :  { %1705 = vmatpush1.bf16.msra.mxu0 %v3169_v44  ;;  %1869 = vmatpush1.bf16.msra.mxu1 %v3172_v45  ;;  %v3259_v44 = vld [vmem:[#allocation4 + $0x4a0] ss:$16 sps:$4 sm:$0xff]   ;;  %v3262_v45 = vld [vmem:[#allocation4 + $0x4a8] ss:$16 sps:$4 sm:$0xff]  }
  0x6e   :  { %1706 = vmatprep.subr.bf16.mxu0 %v3177_v46  ;;  %1870 = vmatprep.subr.bf16.mxu1 %v3180_v47  ;;  %v3267_v46 = vld [vmem:[#allocation4 + $0x4c4] ss:$16 sps:$4 sm:$0xff]   ;;  %v3270_v47 = vld [vmem:[#allocation4 + $0x4cc] ss:$16 sps:$4 sm:$0xff]  }
  0x71   :  { %1707 = vmatpush1.bf16.msra.mxu0 %v3175_v48  ;;  %1871 = vmatpush1.bf16.msra.mxu1 %v3178_v49  ;;  %v3265_v48 = vld [vmem:[#allocation4 + $0x4c0] ss:$16 sps:$4 sm:$0xff]   ;;  %v3268_v49 = vld [vmem:[#allocation4 + $0x4c8] ss:$16 sps:$4 sm:$0xff]  }
  0x72   :  { %1708 = vmatprep.subr.bf16.mxu0 %v3183_v50  ;;  %1872 = vmatprep.subr.bf16.mxu1 %v3186_v51  ;;  %v3273_v50 = vld [vmem:[#allocation4 + $0x4e4] ss:$16 sps:$4 sm:$0xff]   ;;  %v3276_v51 = vld [vmem:[#allocation4 + $0x4ec] ss:$16 sps:$4 sm:$0xff]  }
  0x75   :  { %1709 = vmatpush1.bf16.msra.mxu0 %v3181_v52  ;;  %1873 = vmatpush1.bf16.msra.mxu1 %v3184_v53  ;;  %v3271_v52 = vld [vmem:[#allocation4 + $0x4e0] ss:$16 sps:$4 sm:$0xff]   ;;  %v3274_v53 = vld [vmem:[#allocation4 + $0x4e8] ss:$16 sps:$4 sm:$0xff]  }
  0x76   :  { %1710 = vmatprep.subr.bf16.mxu0 %v3189_v54  ;;  %1874 = vmatprep.subr.bf16.mxu1 %v3192_v55  ;;  %v3279_v54 = vld [vmem:[#allocation4 + $0x504] ss:$16 sps:$4 sm:$0xff]   ;;  %v3282_v55 = vld [vmem:[#allocation4 + $0x50c] ss:$16 sps:$4 sm:$0xff]  }
  0x79   :  { %1711 = vmatpush1.bf16.msra.mxu0 %v3187_v56  ;;  %1875 = vmatpush1.bf16.msra.mxu1 %v3190_v57  ;;  %v3277_v56 = vld [vmem:[#allocation4 + $0x500] ss:$16 sps:$4 sm:$0xff]   ;;  %v3280_v57 = vld [vmem:[#allocation4 + $0x508] ss:$16 sps:$4 sm:$0xff]  }
  0x7a   :  { %1712 = vmatprep.subr.bf16.mxu0 %v3195_v58  ;;  %1876 = vmatprep.subr.bf16.mxu1 %v3198_v59  ;;  %v3285_v58 = vld [vmem:[#allocation4 + $0x524] ss:$16 sps:$4 sm:$0xff]   ;;  %v3288_v59 = vld [vmem:[#allocation4 + $0x52c] ss:$16 sps:$4 sm:$0xff]  }
  0x7d   :  { %1713 = vmatpush1.bf16.msra.mxu0 %v3193_v60  ;;  %1877 = vmatpush1.bf16.msra.mxu1 %v3196_v61  ;;  %v3283_v60 = vld [vmem:[#allocation4 + $0x520] ss:$16 sps:$4 sm:$0xff]   ;;  %v3286_v61 = vld [vmem:[#allocation4 + $0x528] ss:$16 sps:$4 sm:$0xff]  }
  0x7e   :  { %1714 = vmatprep.subr.bf16.mxu0 %v3201_v62  ;;  %1878 = vmatprep.subr.bf16.mxu1 %v3204_v63  ;;  %v3291_v62 = vld [vmem:[#allocation4 + $0x544] ss:$16 sps:$4 sm:$0xff]   ;;  %v3294_v63 = vld [vmem:[#allocation4 + $0x54c] ss:$16 sps:$4 sm:$0xff]  }
  0x81   :  { %1715 = vmatpush1.bf16.msra.mxu0 %v3199_v0  ;;  %1879 = vmatpush1.bf16.msra.mxu1 %v3202_v1  ;;  %v3289_v0 = vld [vmem:[#allocation4 + $0x540] ss:$16 sps:$4 sm:$0xff]   ;;  %v3292_v1 = vld [vmem:[#allocation4 + $0x548] ss:$16 sps:$4 sm:$0xff]  }
  0x82   :  { %1716 = vmatprep.subr.bf16.mxu0 %v3207_v2  ;;  %1880 = vmatprep.subr.bf16.mxu1 %v3210_v3  ;;  %v3297_v2 = vld [vmem:[#allocation4 + $0x564] ss:$16 sps:$4 sm:$0xff]   ;;  %v3300_v3 = vld [vmem:[#allocation4 + $0x56c] ss:$16 sps:$4 sm:$0xff]  }
  0x85   :  { %1717 = vmatpush1.bf16.msra.mxu0 %v3205_v4  ;;  %1881 = vmatpush1.bf16.msra.mxu1 %v3208_v5  ;;  %v3295_v4 = vld [vmem:[#allocation4 + $0x560] ss:$16 sps:$4 sm:$0xff]   ;;  %v3298_v5 = vld [vmem:[#allocation4 + $0x568] ss:$16 sps:$4 sm:$0xff]  }
  0x86   :  { %1718 = vmatprep.subr.bf16.mxu0 %v3213_v6  ;;  %1882 = vmatprep.subr.bf16.mxu1 %v3216_v7  ;;  %v3303_v6 = vld [vmem:[#allocation4 + $0x584] ss:$16 sps:$4 sm:$0xff]   ;;  %v3306_v7 = vld [vmem:[#allocation4 + $0x58c] ss:$16 sps:$4 sm:$0xff]  }
  0x89   :  { %1719 = vmatpush1.bf16.msra.mxu0 %v3211_v8  ;;  %1883 = vmatpush1.bf16.msra.mxu1 %v3214_v9  ;;  %v3301_v8 = vld [vmem:[#allocation4 + $0x580] ss:$16 sps:$4 sm:$0xff]   ;;  %v3304_v9 = vld [vmem:[#allocation4 + $0x588] ss:$16 sps:$4 sm:$0xff]  }
  0x8a   :  { %1720 = vmatprep.subr.bf16.mxu0 %v3219_v10  ;;  %1884 = vmatprep.subr.bf16.mxu1 %v3222_v11  ;;  %v3309_v10 = vld [vmem:[#allocation4 + $0x5a4] ss:$16 sps:$4 sm:$0xff]   ;;  %v3312_v11 = vld [vmem:[#allocation4 + $0x5ac] ss:$16 sps:$4 sm:$0xff]  }
  0x8d   :  { %1721 = vmatpush1.bf16.msra.mxu0 %v3217_v12  ;;  %1885 = vmatpush1.bf16.msra.mxu1 %v3220_v13  ;;  %v3307_v12 = vld [vmem:[#allocation4 + $0x5a0] ss:$16 sps:$4 sm:$0xff]   ;;  %v3310_v13 = vld [vmem:[#allocation4 + $0x5a8] ss:$16 sps:$4 sm:$0xff]  }
  0x8e   :  { %1722 = vmatprep.subr.bf16.mxu0 %v3225_v14  ;;  %1886 = vmatprep.subr.bf16.mxu1 %v3228_v16  ;;  %v3315_v14 = vld [vmem:[#allocation4 + $0x5c4] ss:$16 sps:$4 sm:$0xff]   ;;  %v3318_v16 = vld [vmem:[#allocation4 + $0x5cc] ss:$16 sps:$4 sm:$0xff]  }
  0x91   :  { %1723 = vmatpush1.bf16.msra.mxu0 %v3223_v17  ;;  %1887 = vmatpush1.bf16.msra.mxu1 %v3226_v18  ;;  %v3313_v17 = vld [vmem:[#allocation4 + $0x5c0] ss:$16 sps:$4 sm:$0xff]   ;;  %v3316_v18 = vld [vmem:[#allocation4 + $0x5c8] ss:$16 sps:$4 sm:$0xff]  }
  0x92   :  { %1733 = vmatprep.subr.bf16.mxu0 %v3231_v19  ;;  %1897 = vmatprep.subr.bf16.mxu1 %v3234_v22  ;;  %v3321_v19 = vld [vmem:[#allocation4 + $0x5e4] ss:$16 sps:$4 sm:$0xff]   ;;  %v3324_v22 = vld [vmem:[#allocation4 + $0x5ec] ss:$16 sps:$4 sm:$0xff]  }
  0x94   :  { %1725 = vmatmul.mubr.bf16.vlgmr.msra.gmra.mrb[0].mxu0 %v359_v24  ;;  %1889 = vmatmul.mubr.bf16.vlgmr.msra.gmra.mrb[0].mxu1 %v359_v24  ;;  %v3322_v24 = vld [vmem:[#allocation4 + $0x5e8] ss:$16 sps:$4 sm:$0xff]  }
  0x95   :  { %1734 = vmatpush1.bf16.msra.mxu0 %v3229_v23  ;;  %1898 = vmatpush1.bf16.msra.mxu1 %v3232_v25  ;;  %v3319_v23 = vld [vmem:[#allocation4 + $0x5e0] ss:$16 sps:$4 sm:$0xff]   ;;  %v3328_v25 = vld [vmem:[#allocation4 + $0x604] ss:$16 sps:$4 sm:$0xff]  }
  0x96   :  { %1735 = vmatprep.subr.bf16.mxu0 %v3237_v26  ;;  %1899 = vmatprep.subr.bf16.mxu1 %v3240_v27  ;;  %v3331_v26 = vld [vmem:[#allocation4 + $0x60c] ss:$16 sps:$4 sm:$0xff]   ;;  %v3326_v27 = vld [vmem:[#allocation4 + $0x600] ss:$16 sps:$4 sm:$0xff]  }
  0x97   :  { %1765 = vmatprep.mubr.bf16.mxu0 %v3588_v20  ;;  %1929 = vmatprep.mubr.bf16.mxu1 %v3588_v20 }
  0x99   :  { %1736 = vmatpush1.bf16.msra.mxu0 %v3235_v28  ;;  %1900 = vmatpush1.bf16.msra.mxu1 %v3238_v29  ;;  %v3329_v28 = vld [vmem:[#allocation4 + $0x608] ss:$16 sps:$4 sm:$0xff]   ;;  %v3334_v29 = vld [vmem:[#allocation4 + $0x624] ss:$16 sps:$4 sm:$0xff]  }
  0x9a   :  { %1737 = vmatprep.subr.bf16.mxu0 %v3243_v30  ;;  %1901 = vmatprep.subr.bf16.mxu1 %v3246_v31  ;;  %v3337_v30 = vld [vmem:[#allocation4 + $0x62c] ss:$16 sps:$4 sm:$0xff]   ;;  %v362_v31 = vcombine.high %v3588_v20, %v3588_v20  ;;  %v3346_v20 = vld [vmem:[#allocation4 + $0x664] ss:$16 sps:$4 sm:$0xff]  }
  0x9d   :  { %1738 = vmatpush1.bf16.msra.mxu0 %v3241_v15  ;;  %1902 = vmatpush1.bf16.msra.mxu1 %v3244_v32  ;;  %v3332_v15 = vld [vmem:[#allocation4 + $0x620] ss:$16 sps:$4 sm:$0xff]   ;;  %v3335_v32 = vld [vmem:[#allocation4 + $0x628] ss:$16 sps:$4 sm:$0xff]  }
  0x9e   :  { %1739 = vmatprep.subr.bf16.mxu0 %v3249_v33  ;;  %1903 = vmatprep.subr.bf16.mxu1 %v3252_v34  ;;  %v3340_v33 = vld [vmem:[#allocation4 + $0x644] ss:$16 sps:$4 sm:$0xff]   ;;  %v3343_v34 = vld [vmem:[#allocation4 + $0x64c] ss:$16 sps:$4 sm:$0xff]  }
  0xa1   :  { %1740 = vmatpush1.bf16.msra.mxu0 %v3247_v35  ;;  %1904 = vmatpush1.bf16.msra.mxu1 %v3250_v36  ;;  %v3338_v35 = vld [vmem:[#allocation4 + $0x640] ss:$16 sps:$4 sm:$0xff]   ;;  %v3341_v36 = vld [vmem:[#allocation4 + $0x648] ss:$16 sps:$4 sm:$0xff]  }
  0xa2   :  { %1741 = vmatprep.subr.bf16.mxu0 %v3255_v37  ;;  %1905 = vmatprep.subr.bf16.mxu1 %v3258_v38  ;;  %v3349_v37 = vld [vmem:[#allocation4 + $0x66c] ss:$16 sps:$4 sm:$0xff]   ;;  %v3344_v38 = vld [vmem:[#allocation4 + $0x660] ss:$16 sps:$4 sm:$0xff]  }
  0xa5   :  { %1742 = vmatpush1.bf16.msra.mxu0 %v3253_v39  ;;  %1906 = vmatpush1.bf16.msra.mxu1 %v3256_v40  ;;  %v3347_v39 = vld [vmem:[#allocation4 + $0x668] ss:$16 sps:$4 sm:$0xff]   ;;  %v3352_v40 = vld [vmem:[#allocation4 + $0x684] ss:$16 sps:$4 sm:$0xff]  }
  0xa6   :  { %1743 = vmatprep.subr.bf16.mxu0 %v3261_v41  ;;  %1907 = vmatprep.subr.bf16.mxu1 %v3264_v42  ;;  %v3355_v41 = vld [vmem:[#allocation4 + $0x68c] ss:$16 sps:$4 sm:$0xff]   ;;  %v3350_v42 = vld [vmem:[#allocation4 + $0x680] ss:$16 sps:$4 sm:$0xff]  }
  0xa9   :  { %1744 = vmatpush1.bf16.msra.mxu0 %v3259_v44  ;;  %1908 = vmatpush1.bf16.msra.mxu1 %v3262_v45  ;;  %v3353_v44 = vld [vmem:[#allocation4 + $0x688] ss:$16 sps:$4 sm:$0xff]   ;;  %v3358_v45 = vld [vmem:[#allocation4 + $0x6a4] ss:$16 sps:$4 sm:$0xff]  }
  0xaa   :  { %1745 = vmatprep.subr.bf16.mxu0 %v3267_v46  ;;  %1909 = vmatprep.subr.bf16.mxu1 %v3270_v47  ;;  %v3361_v46 = vld [vmem:[#allocation4 + $0x6ac] ss:$16 sps:$4 sm:$0xff]   ;;  %v3356_v47 = vld [vmem:[#allocation4 + $0x6a0] ss:$16 sps:$4 sm:$0xff]  }
  0xad   :  { %1746 = vmatpush1.bf16.msra.mxu0 %v3265_v48  ;;  %1910 = vmatpush1.bf16.msra.mxu1 %v3268_v49  ;;  %v3359_v48 = vld [vmem:[#allocation4 + $0x6a8] ss:$16 sps:$4 sm:$0xff]   ;;  %v3364_v49 = vld [vmem:[#allocation4 + $0x6c4] ss:$16 sps:$4 sm:$0xff]  }
  0xae   :  { %1747 = vmatprep.subr.bf16.mxu0 %v3273_v50  ;;  %1911 = vmatprep.subr.bf16.mxu1 %v3276_v51  ;;  %v3367_v50 = vld [vmem:[#allocation4 + $0x6cc] ss:$16 sps:$4 sm:$0xff]   ;;  %v3362_v51 = vld [vmem:[#allocation4 + $0x6c0] ss:$16 sps:$4 sm:$0xff]  }
  0xb1   :  { %1748 = vmatpush1.bf16.msra.mxu0 %v3271_v52  ;;  %1912 = vmatpush1.bf16.msra.mxu1 %v3274_v53  ;;  %v3365_v52 = vld [vmem:[#allocation4 + $0x6c8] ss:$16 sps:$4 sm:$0xff]   ;;  %v3370_v53 = vld [vmem:[#allocation4 + $0x6e4] ss:$16 sps:$4 sm:$0xff]  }
  0xb2   :  { %1749 = vmatprep.subr.bf16.mxu0 %v3279_v54  ;;  %1913 = vmatprep.subr.bf16.mxu1 %v3282_v55  ;;  %v3373_v54 = vld [vmem:[#allocation4 + $0x6ec] ss:$16 sps:$4 sm:$0xff]   ;;  %v3368_v55 = vld [vmem:[#allocation4 + $0x6e0] ss:$16 sps:$4 sm:$0xff]  }
  0xb5   :  { %1750 = vmatpush1.bf16.msra.mxu0 %v3277_v56  ;;  %1914 = vmatpush1.bf16.msra.mxu1 %v3280_v57  ;;  %v3371_v56 = vld [vmem:[#allocation4 + $0x6e8] ss:$16 sps:$4 sm:$0xff]   ;;  %v3376_v57 = vld [vmem:[#allocation4 + $0x704] ss:$16 sps:$4 sm:$0xff]  }
  0xb6   :  { %1751 = vmatprep.subr.bf16.mxu0 %v3285_v58  ;;  %1915 = vmatprep.subr.bf16.mxu1 %v3288_v59  ;;  %v3379_v58 = vld [vmem:[#allocation4 + $0x70c] ss:$16 sps:$4 sm:$0xff]   ;;  %v3374_v59 = vld [vmem:[#allocation4 + $0x700] ss:$16 sps:$4 sm:$0xff]  }
  0xb9   :  { %1752 = vmatpush1.bf16.msra.mxu0 %v3283_v60  ;;  %1916 = vmatpush1.bf16.msra.mxu1 %v3286_v61  ;;  %v3377_v60 = vld [vmem:[#allocation4 + $0x708] ss:$16 sps:$4 sm:$0xff]   ;;  %v3382_v61 = vld [vmem:[#allocation4 + $0x724] ss:$16 sps:$4 sm:$0xff]  }
  0xba   :  { %1753 = vmatprep.subr.bf16.mxu0 %v3291_v62  ;;  %1917 = vmatprep.subr.bf16.mxu1 %v3294_v63  ;;  %v3385_v62 = vld [vmem:[#allocation4 + $0x72c] ss:$16 sps:$4 sm:$0xff]   ;;  %v3380_v63 = vld [vmem:[#allocation4 + $0x720] ss:$16 sps:$4 sm:$0xff]  }
  0xbd   :  { %1754 = vmatpush1.bf16.msra.mxu0 %v3289_v0  ;;  %1918 = vmatpush1.bf16.msra.mxu1 %v3292_v1  ;;  %v3383_v0 = vld [vmem:[#allocation4 + $0x728] ss:$16 sps:$4 sm:$0xff]   ;;  %v3388_v1 = vld [vmem:[#allocation4 + $0x744] ss:$16 sps:$4 sm:$0xff]  }
  0xbe   :  { %1755 = vmatprep.subr.bf16.mxu0 %v3297_v2  ;;  %1919 = vmatprep.subr.bf16.mxu1 %v3300_v3  ;;  %v3391_v2 = vld [vmem:[#allocation4 + $0x74c] ss:$16 sps:$4 sm:$0xff]   ;;  %v3386_v3 = vld [vmem:[#allocation4 + $0x740] ss:$16 sps:$4 sm:$0xff]  }
  0xc1   :  { %1756 = vmatpush1.bf16.msra.mxu0 %v3295_v4  ;;  %1920 = vmatpush1.bf16.msra.mxu1 %v3298_v5  ;;  %v3389_v4 = vld [vmem:[#allocation4 + $0x748] ss:$16 sps:$4 sm:$0xff]   ;;  %v3394_v5 = vld [vmem:[#allocation4 + $0x764] ss:$16 sps:$4 sm:$0xff]  }
  0xc2   :  { %1757 = vmatprep.subr.bf16.mxu0 %v3303_v6  ;;  %1921 = vmatprep.subr.bf16.mxu1 %v3306_v7  ;;  %v3397_v6 = vld [vmem:[#allocation4 + $0x76c] ss:$16 sps:$4 sm:$0xff]   ;;  %v3392_v7 = vld [vmem:[#allocation4 + $0x760] ss:$16 sps:$4 sm:$0xff]  }
  0xc5   :  { %1758 = vmatpush1.bf16.msra.mxu0 %v3301_v8  ;;  %1922 = vmatpush1.bf16.msra.mxu1 %v3304_v9  ;;  %v3395_v8 = vld [vmem:[#allocation4 + $0x768] ss:$16 sps:$4 sm:$0xff]   ;;  %v3400_v9 = vld [vmem:[#allocation4 + $0x784] ss:$16 sps:$4 sm:$0xff]  }
  0xc6   :  { %1759 = vmatprep.subr.bf16.mxu0 %v3309_v10  ;;  %1923 = vmatprep.subr.bf16.mxu1 %v3312_v11  ;;  %v3403_v10 = vld [vmem:[#allocation4 + $0x78c] ss:$16 sps:$4 sm:$0xff]   ;;  %v3398_v11 = vld [vmem:[#allocation4 + $0x780] ss:$16 sps:$4 sm:$0xff]  }
  0xc9   :  { %1760 = vmatpush1.bf16.msra.mxu0 %v3307_v12  ;;  %1924 = vmatpush1.bf16.msra.mxu1 %v3310_v13  ;;  %v3401_v12 = vld [vmem:[#allocation4 + $0x788] ss:$16 sps:$4 sm:$0xff]   ;;  %v3406_v13 = vld [vmem:[#allocation4 + $0x7a4] ss:$16 sps:$4 sm:$0xff]  }
  0xca   :  { %1761 = vmatprep.subr.bf16.mxu0 %v3315_v14  ;;  %1925 = vmatprep.subr.bf16.mxu1 %v3318_v16  ;;  %v3409_v14 = vld [vmem:[#allocation4 + $0x7ac] ss:$16 sps:$4 sm:$0xff]   ;;  %v3404_v16 = vld [vmem:[#allocation4 + $0x7a0] ss:$16 sps:$4 sm:$0xff]  }
  0xcd   :  { %1762 = vmatpush1.bf16.msra.mxu0 %v3313_v17  ;;  %1926 = vmatpush1.bf16.msra.mxu1 %v3316_v18  ;;  %v3407_v17 = vld [vmem:[#allocation4 + $0x7a8] ss:$16 sps:$4 sm:$0xff]   ;;  %v3412_v18 = vld [vmem:[#allocation4 + $0x7c4] ss:$16 sps:$4 sm:$0xff]  }
  0xce   :  { %1763 = vmatprep.subr.bf16.mxu0 %v3321_v19  ;;  %1927 = vmatprep.subr.bf16.mxu1 %v3324_v22  ;;  %v3415_v19 = vld [vmem:[#allocation4 + $0x7cc] ss:$16 sps:$4 sm:$0xff]   ;;  %v3410_v22 = vld [vmem:[#allocation4 + $0x7c0] ss:$16 sps:$4 sm:$0xff]  }
  0xd1   :  { %1764 = vmatpush1.bf16.msra.mxu0 %v3319_v23  ;;  %1928 = vmatpush1.bf16.msra.mxu1 %v3322_v24  ;;  %v3413_v23 = vld [vmem:[#allocation4 + $0x7c8] ss:$16 sps:$4 sm:$0xff]   ;;  %v3418_v24 = vld [vmem:[#allocation4 + $0x7e4] ss:$16 sps:$4 sm:$0xff]  }
  0xd2   :  { %1774 = vmatprep.subr.bf16.mxu0 %v3328_v25  ;;  %1938 = vmatprep.subr.bf16.mxu1 %v3331_v26  ;;  %v3421_v25 = vld [vmem:[#allocation4 + $0x7ec] ss:$16 sps:$4 sm:$0xff]   ;;  %v3416_v26 = vld [vmem:[#allocation4 + $0x7e0] ss:$16 sps:$4 sm:$0xff]  }
  0xd4   :  { %1766 = vmatmul.mubr.bf16.vlgmr.msra.gmra.mrb[0].mxu0 %v3591_v21  ;;  %1930 = vmatmul.mubr.bf16.vlgmr.msra.gmra.mrb[0].mxu1 %v3591_v21 }
  0xd5   :  { %1775 = vmatpush1.bf16.msra.mxu0 %v3326_v27  ;;  %1939 = vmatpush1.bf16.msra.mxu1 %v3329_v28  ;;  %v3419_v27 = vld [vmem:[#allocation4 + $0x7e8] ss:$16 sps:$4 sm:$0xff]   ;;  %v360_v28 = vcombine.high %v3591_v21, %v3591_v21  ;;  %v3425_v21 = vld [vmem:[%s3792_s6 + $0x80] sm:$0xff]  }
  0xd6   :  { %1776 = vmatprep.subr.bf16.mxu0 %v3334_v29  ;;  %1940 = vmatprep.subr.bf16.mxu1 %v3337_v30  ;;  %v3422_v29 = vld [vmem:[%s3792_s6 + $0x40] sm:$0xff]  }
  0xd7   :  { %1806 = vmatprep.mubr.bf16.mxu0 %v362_v31  ;;  %1970 = vmatprep.mubr.bf16.mxu1 %v362_v31  ;;  %v3423_v30 = vld [vmem:[%s3792_s6] sm:$0xff]  }
  0xd8   :  { %v3424_v31 = vld [vmem:[%s3792_s6 + $0xc0] sm:$0xff]  }
  0xd9   :  { %1777 = vmatpush1.bf16.msra.mxu0 %v3332_v15  ;;  %1941 = vmatpush1.bf16.msra.mxu1 %v3335_v32  ;;  %v3426_v15 = vld [vmem:[%s3792_s6 + $0x48] sm:$0xff]  }
  0xda   :  { %1778 = vmatprep.subr.bf16.mxu0 %v3340_v33  ;;  %1942 = vmatprep.subr.bf16.mxu1 %v3343_v34  ;;  %v3427_v32 = vld [vmem:[%s3792_s6 + $0x8] sm:$0xff]   ;;  %v3430_v34 = vld [vmem:[%s3792_s6 + $0x50] sm:$0xff]  }
  0xdb   :  { %v3428_v33 = vld [vmem:[%s3792_s6 + $0xc8] sm:$0xff]  }
  0xdd   :  { %1779 = vmatpush1.bf16.msra.mxu0 %v3338_v35  ;;  %1943 = vmatpush1.bf16.msra.mxu1 %v3341_v36  ;;  %v3429_v35 = vld [vmem:[%s3792_s6 + $0x88] sm:$0xff]   ;;  %v3432_v36 = vld [vmem:[%s3792_s6 + $0xd0] sm:$0xff]  }
  0xde   :  { %1780 = vmatprep.subr.bf16.mxu0 %v3346_v20  ;;  %1944 = vmatprep.subr.bf16.mxu1 %v3349_v37  ;;  %v3431_v20 = vld [vmem:[%s3792_s6 + $0x10] sm:$0xff]   ;;  %v3434_v37 = vld [vmem:[%s3792_s6 + $0x58] sm:$0xff]  }
  0xe1   :  { %1781 = vmatpush1.bf16.msra.mxu0 %v3344_v38  ;;  %1945 = vmatpush1.bf16.msra.mxu1 %v3347_v39  ;;  %v3433_v38 = vld [vmem:[%s3792_s6 + $0x90] sm:$0xff]   ;;  %v3436_v39 = vld [vmem:[%s3792_s6 + $0xd8] sm:$0xff]  }
  0xe2   :  { %1782 = vmatprep.subr.bf16.mxu0 %v3352_v40  ;;  %1946 = vmatprep.subr.bf16.mxu1 %v3355_v41  ;;  %v3435_v40 = vld [vmem:[%s3792_s6 + $0x18] sm:$0xff]   ;;  %v3438_v41 = vld [vmem:[%s3792_s6 + $0x60] sm:$0xff]  }
  0xe5   :  { %1783 = vmatpush1.bf16.msra.mxu0 %v3350_v42  ;;  %1947 = vmatpush1.bf16.msra.mxu1 %v3353_v44  ;;  %v3437_v42 = vld [vmem:[%s3792_s6 + $0x98] sm:$0xff]   ;;  %v3440_v44 = vld [vmem:[%s3792_s6 + $0xe0] sm:$0xff]  }
  0xe6   :  { %1784 = vmatprep.subr.bf16.mxu0 %v3358_v45  ;;  %1948 = vmatprep.subr.bf16.mxu1 %v3361_v46  ;;  %v3439_v45 = vld [vmem:[%s3792_s6 + $0x20] sm:$0xff]   ;;  %v3442_v46 = vld [vmem:[%s3792_s6 + $0x68] sm:$0xff]  }
  0xe9   :  { %1785 = vmatpush1.bf16.msra.mxu0 %v3356_v47  ;;  %1949 = vmatpush1.bf16.msra.mxu1 %v3359_v48  ;;  %v3441_v47 = vld [vmem:[%s3792_s6 + $0xa0] sm:$0xff]   ;;  %v3444_v48 = vld [vmem:[%s3792_s6 + $0xe8] sm:$0xff]  }
  0xea   :  { %1786 = vmatprep.subr.bf16.mxu0 %v3364_v49  ;;  %1950 = vmatprep.subr.bf16.mxu1 %v3367_v50  ;;  %v3443_v49 = vld [vmem:[%s3792_s6 + $0x28] sm:$0xff]   ;;  %v3446_v50 = vld [vmem:[%s3792_s6 + $0x70] sm:$0xff]  }
  0xed   :  { %1787 = vmatpush1.bf16.msra.mxu0 %v3362_v51  ;;  %1951 = vmatpush1.bf16.msra.mxu1 %v3365_v52  ;;  %v3445_v51 = vld [vmem:[%s3792_s6 + $0xa8] sm:$0xff]   ;;  %v3448_v52 = vld [vmem:[%s3792_s6 + $0xf0] sm:$0xff]  }
  0xee   :  { %1788 = vmatprep.subr.bf16.mxu0 %v3370_v53  ;;  %1952 = vmatprep.subr.bf16.mxu1 %v3373_v54  ;;  %v3447_v53 = vld [vmem:[%s3792_s6 + $0x30] sm:$0xff]   ;;  %v3450_v54 = vld [vmem:[%s3792_s6 + $0x78] sm:$0xff]  }
  0xf1   :  { %1789 = vmatpush1.bf16.msra.mxu0 %v3368_v55  ;;  %1953 = vmatpush1.bf16.msra.mxu1 %v3371_v56  ;;  %v3449_v55 = vld [vmem:[%s3792_s6 + $0xb0] sm:$0xff]   ;;  %v3452_v56 = vld [vmem:[%s3792_s6 + $0xf8] sm:$0xff]  }
  0xf2   :  { %1790 = vmatprep.subr.bf16.mxu0 %v3376_v57  ;;  %1954 = vmatprep.subr.bf16.mxu1 %v3379_v58  ;;  %v3451_v57 = vld [vmem:[%s3792_s6 + $0x38] sm:$0xff]  }
  0xf3   :  { %v3453_v58 = vld [vmem:[%s3792_s6 + $0xb8] sm:$0xff]  }
  0xf5   :  { %1791 = vmatpush1.bf16.msra.mxu0 %v3374_v59  ;;  %1955 = vmatpush1.bf16.msra.mxu1 %v3377_v60  ;;  %v3514_v59 = vmov 1983009808  }
  0xf6   :  { %1792 = vmatprep.subr.bf16.mxu0 %v3382_v61  ;;  %1956 = vmatprep.subr.bf16.mxu1 %v3385_v62  ;;  %v1986_v60 = vunpack.c.l.s4 %v3514_v59  ;;  %v3702_v61 = vsub.s32 0, %v3573_v43  ;;  %v3705_v62 = vsub.s32 1, %v3573_v43 }
  0xf9   :  { %1793 = vmatpush1.bf16.msra.mxu0 %v3380_v63  ;;  %1957 = vmatpush1.bf16.msra.mxu1 %v3383_v0  ;;  %v3708_v63 = vsub.s32 2, %v3573_v43  ;;  %v3711_v0 = vsub.s32 3, %v3573_v43 }
  0xfa   :  { %1794 = vmatprep.subr.bf16.mxu0 %v3388_v1  ;;  %1958 = vmatprep.subr.bf16.mxu1 %v3391_v2  ;;  %v2007_v1 = vld [vmem:[%s3789_s3] sm:$0xf]  ;;  %v1987_v2 = vunpack.c.0.s8 %v1986_v60 }
  0xfd   :  { %1795 = vmatpush1.bf16.msra.mxu0 %v3386_v3  ;;  %1959 = vmatpush1.bf16.msra.mxu1 %v3389_v4  ;;  %v2012_v3 = vrot.slane %v2007_v1, %v3702_v61  ;;  %v2016_v4 = vrot.slane %v2007_v1, %v3705_v62 }
  0xfe   :  { %1796 = vmatprep.subr.bf16.mxu0 %v3394_v5  ;;  %1960 = vmatprep.subr.bf16.mxu1 %v3397_v6  ;;  %v2020_v5 = vrot.slane %v2007_v1, %v3708_v63  ;;  %v2024_v6 = vrot.slane %v2007_v1, %v3711_v0 }
 0x101   :  { %1797 = vmatpush1.bf16.msra.mxu0 %v3392_v7  ;;  %1961 = vmatpush1.bf16.msra.mxu1 %v3395_v8  ;;  %v3721_v7 = vsub.s32 %v1987_v2, %v3573_v43  ;;  %v2025_v8 = vcombine.low %v2012_v3, %v2016_v4 }
 0x102   :  { %1798 = vmatprep.subr.bf16.mxu0 %v3400_v9  ;;  %1962 = vmatprep.subr.bf16.mxu1 %v3403_v10  ;;  %v2026_v9 = vcombine.low %v2020_v5, %v2024_v6 }
 0x105   :  { %1799 = vmatpush1.bf16.msra.mxu0 %v3398_v11  ;;  %1963 = vmatpush1.bf16.msra.mxu1 %v3401_v12  ;;  %v2033_v12 = vrot.slane %v2025_v8, %v3721_v7 }
 0x106   :  { %1800 = vmatprep.subr.bf16.mxu0 %v3406_v13  ;;  %1964 = vmatprep.subr.bf16.mxu1 %v3409_v14  ;;  %v2040_v13 = vrot.slane %v2026_v9, %v3721_v7 }
 0x109   :  { %1801 = vmatpush1.bf16.msra.mxu0 %v3404_v16  ;;  %1965 = vmatpush1.bf16.msra.mxu1 %v3407_v17 }
 0x10a   :  { %1802 = vmatprep.subr.bf16.mxu0 %v3412_v18  ;;  %1966 = vmatprep.subr.bf16.mxu1 %v3415_v19 }
 0x10d   :  { %1803 = vmatpush1.bf16.msra.mxu0 %v3410_v22  ;;  %1967 = vmatpush1.bf16.msra.mxu1 %v3413_v23 }
 0x10e   :  { %1804 = vmatprep.subr.bf16.mxu0 %v3418_v24  ;;  %1968 = vmatprep.subr.bf16.mxu1 %v3421_v25 }
 0x111   :  { %1805 = vmatpush1.bf16.msra.mxu0 %v3416_v26  ;;  %1969 = vmatpush1.bf16.msra.mxu1 %v3419_v27  ;;  %v2041_v26 = vcombine.low %v2033_v12, %v2040_v13 }
 0x112   :  { %2963 = vmatprep.subr.bf16.mxu0 %v3422_v29  ;;  %2985 = vmatprep.subr.bf16.mxu1 %v3424_v31 }
 0x114   :  { %1807 = vmatmul.mubr.bf16.vlgmr.msra.gmra.mrb[0].mxu0 %v360_v28  ;;  %1971 = vmatmul.mubr.bf16.vlgmr.msra.gmra.mrb[0].mxu1 %v360_v28  ;;  %v2046_v28 = vstv %s3786_s0 }
 0x115   :  { %2964 = vmatpush3.bf16.msra.mxu0 %v3423_v30  ;;  %2986 = vmatpush3.bf16.msra.mxu1 %v3425_v21 }
 0x116   :  { %2965 = vmatprep.subr.bf16.mxu0 %v3426_v15  ;;  %2987 = vmatprep.subr.bf16.mxu1 %v3428_v33 }
 0x119   :  { %2966 = vmatpush3.bf16.msra.mxu0 %v3427_v32  ;;  %2988 = vmatpush3.bf16.msra.mxu1 %v3429_v35 }
 0x11a   :  { %2967 = vmatprep.subr.bf16.mxu0 %v3430_v34  ;;  %2989 = vmatprep.subr.bf16.mxu1 %v3432_v36 }
 0x11d   :  { %2968 = vmatpush3.bf16.msra.mxu0 %v3431_v20  ;;  %2990 = vmatpush3.bf16.msra.mxu1 %v3433_v38 }
 0x11e   :  { %2969 = vmatprep.subr.bf16.mxu0 %v3434_v37  ;;  %2991 = vmatprep.subr.bf16.mxu1 %v3436_v39 }
 0x121   :  { %2970 = vmatpush3.bf16.msra.mxu0 %v3435_v40  ;;  %2992 = vmatpush3.bf16.msra.mxu1 %v3437_v42 }
 0x122   :  { %2971 = vmatprep.subr.bf16.mxu0 %v3438_v41  ;;  %2993 = vmatprep.subr.bf16.mxu1 %v3440_v44 }
 0x125   :  { %2972 = vmatpush3.bf16.msra.mxu0 %v3439_v45  ;;  %2994 = vmatpush3.bf16.msra.mxu1 %v3441_v47 }
 0x126   :  { %2973 = vmatprep.subr.bf16.mxu0 %v3442_v46  ;;  %2995 = vmatprep.subr.bf16.mxu1 %v3444_v48 }
 0x129   :  { %2974 = vmatpush3.bf16.msra.mxu0 %v3443_v49  ;;  %2996 = vmatpush3.bf16.msra.mxu1 %v3445_v51 }
 0x12a   :  { %2975 = vmatprep.subr.bf16.mxu0 %v3446_v50  ;;  %2997 = vmatprep.subr.bf16.mxu1 %v3448_v52 }
 0x12d   :  { %2976 = vmatpush3.bf16.msra.mxu0 %v3447_v53  ;;  %2998 = vmatpush3.bf16.msra.mxu1 %v3449_v55 }
 0x12e   :  { %2977 = vmatprep.subr.bf16.mxu0 %v3450_v54  ;;  %2999 = vmatprep.subr.bf16.mxu1 %v3452_v56 }
 0x131   :  { %2978 = vmatpush3.bf16.msra.mxu0 %v3451_v57  ;;  %3000 = vmatpush3.bf16.msra.mxu1 %v3453_v58 }
 0x1e7   :  { %v1808_v10 = vpop.f32.mrb[0].mxu0  ;;  %v1972_v11 = vpop.f32.mrb[0].mxu1 }
 0x1e8   :  { %v1810_v14 = vpop.f32.mrb[1].mxu0  ;;  %v1974_v16 = vpop.f32.mrb[1].mxu1 }
 0x1e9   :  { %v1983_v17 = vcombine.low %v1808_v10, %v1810_v14  ;;  %v1984_v18 = vcombine.low %v1972_v11, %v1974_v16  ;;  %v1812_v19 = vpop.f32.mrb[2].mxu0  ;;  %v1976_v22 = vpop.f32.mrb[2].mxu1 }
 0x1ea   :  { %v1813_v23 = vpop.f32.mrb[3].mxu0  ;;  %v1977_v24 = vpop.f32.mrb[3].mxu1 }
 0x1eb   :  { %v1991_v25 = vrot.slane %v1983_v17, %v3721_v7  ;;  %v1998_v43 = vrot.slane %v1984_v18, %v3721_v7 }
 0x1ed   :  { %v1999_v27 = vcombine.low %v1991_v25, %v1998_v43 }
 0x1ef   :  { %v2043_v29 = vadd.f32 %v2041_v26, %v1999_v27 }
 0x1f1   :  { %vm2045_vm0 = vcmp.ge.f32.partialorder %v2043_v29, 0.0  ;;  %v2047_v30 = vmul.f32 %v2046_v28, %v2043_v29 }
 0x1f3   :  { %v2048_v31 = vsel %vm2045_vm0, %v2043_v29, %v2047_v30 }
 0x1f4   :  { %v2050_v21 = vcombine.high %v2048_v31, %v2048_v31  ;;  %v2057_v15 = vrot.slane %v2048_v31, %v3721_v7 }
 0x1f6   :  { %v2064_v32 = vrot.slane %v2050_v21, %v3721_v7  ;;  %v2065_v33 = vcombine.high %v2057_v15, %v2057_v15  ;;  %v2072_v34 = vsel %vm2071_vm1, %v2057_v15, 0.0 }
 0x1f7   :  { %v2073_v35 = vrot.slane %v2072_v34, 4 }
 0x1f8   :  { %v2066_v36 = vcombine.high %v2064_v32, %v2064_v32  ;;  %v2079_v20 = vsel %vm2071_vm1, %v2065_v33, 0.0  ;;  %v2086_v37 = vsel %vm2071_vm1, %v2064_v32, 0.0 }
 0x1f9   :  { %v2074_v38 = vadd.f32 %v2073_v35, %v2072_v34  ;;  %v2080_v39 = vrot.slane %v2079_v20, 4  ;;  %v2087_v40 = vrot.slane %v2086_v37, 4 }
 0x1fa   :  { %v2093_v41 = vsel %vm2071_vm1, %v2066_v36, 0.0 }
 0x1fb   :  { %v2075_v42 = vrot.slane %v2074_v38, 2  ;;  %v2081_v44 = vadd.f32 %v2080_v39, %v2079_v20  ;;  %v2088_v45 = vadd.f32 %v2087_v40, %v2086_v37  ;;  %v2094_v46 = vrot.slane %v2093_v41, 4 }
 0x1fd   :  { %v2076_v47 = vadd.f32 %v2075_v42, %v2074_v38  ;;  %v2082_v48 = vrot.slane %v2081_v44, 2  ;;  %v2089_v49 = vrot.slane %v2088_v45, 2  ;;  %v2095_v50 = vadd.f32 %v2094_v46, %v2093_v41 }
 0x1ff   :  { %v2077_v51 = vrot.slane %v2076_v47, 1  ;;  %v2083_v52 = vadd.f32 %v2082_v48, %v2081_v44  ;;  %v2090_v53 = vadd.f32 %v2089_v49, %v2088_v45  ;;  %v2096_v54 = vrot.slane %v2095_v50, 2 }
 0x201   :  { %v2078_v55 = vadd.f32 %v2077_v51, %v2076_v47  ;;  %v2084_v56 = vrot.slane %v2083_v52, 1  ;;  %v2091_v57 = vrot.slane %v2090_v53, 1  ;;  %v2097_v58 = vadd.f32 %v2096_v54, %v2095_v50 }
 0x203   :  { %v2085_v59 = vadd.f32 %v2084_v56, %v2083_v52  ;;  %v2092_v60 = vadd.f32 %v2091_v57, %v2090_v53  ;;  %v2098_v1 = vrot.slane %v2097_v58, 1  ;;  %v2100_v3 = vmul.f32 0.5, %v2078_v55  ;;  %v2213_v56 = vld [vmem:[%s3790_s4] sm:$0xf] }
 0x204   :  { %v2250_v57 = vld [vmem:[%s3791_s5] sm:$0xf] }
 0x205   :  { %v2099_v2 = vadd.f32 %v2098_v1, %v2097_v58  ;;  %v2101_v4 = vmul.f32 0.5, %v2085_v59  ;;  %v2102_v5 = vmul.f32 0.5, %v2092_v60  ;;  %v2218_v58 = vrot.slane %v2213_v56, %v3702_v61 }
 0x206   :  { %v2222_v59 = vrot.slane %v2213_v56, %v3705_v62  ;;  %v2226_v60 = vrot.slane %v2213_v56, %v3708_v63  ;;  %v2230_v1 = vrot.slane %v2213_v56, %v3711_v0 }
 0x207   :  { %v2103_v6 = vmul.f32 0.5, %v2099_v2  ;;  %v2108_v8 = vcombine.low %v2100_v3, %v2101_v4  ;;  %v2255_v2 = vrot.slane %v2250_v57, %v3702_v61  ;;  %v2259_v3 = vrot.slane %v2250_v57, %v3705_v62 }
 0x208   :  { %v2263_v4 = vrot.slane %v2250_v57, %v3708_v63 }
 0x209   :  { %v2109_v9 = vcombine.low %v2102_v5, %v2103_v6  ;;  %v2116_v10 = vrot.slane %v2108_v8, %v3721_v7  ;;  %v2267_v5 = vrot.slane %v2250_v57, %v3711_v0  ;;  %v2231_v8 = vcombine.low %v2218_v58, %v2222_v59 }
 0x20b   :  { %v2123_v11 = vrot.slane %v2109_v9, %v3721_v7  ;;  %v2232_v9 = vcombine.low %v2226_v60, %v2230_v1 }
 0x20d   :  { %v2124_v12 = vcombine.low %v2116_v10, %v2123_v11  ;;  %v2246_v61 = vrot.slane %v2232_v9, %v3721_v7 }
 0x20f   :  { %v3738_v13 = vsub.f32 %v2048_v31, %v2124_v12 }
 0x211   :  { %v2127_v14 = vmul.f32 %v3738_v13, %v3738_v13 }
 0x213   :  { %v2129_v16 = vcombine.high %v2127_v14, %v2127_v14  ;;  %v2136_v17 = vrot.slane %v2127_v14, %v3721_v7  ;;  %v2268_v14 = vcombine.low %v2255_v2, %v2259_v3 }
 0x215   :  { %v2143_v18 = vrot.slane %v2129_v16, %v3721_v7  ;;  %v2144_v19 = vcombine.high %v2136_v17, %v2136_v17  ;;  %v2150_v22 = vsel %vm2071_vm1, %v2136_v17, 0.0  ;;  %v2269_v16 = vcombine.low %v2263_v4, %v2267_v5 }
 0x216   :  { %v2151_v23 = vrot.slane %v2150_v22, 4  ;;  %v2276_v0 = vrot.slane %v2268_v14, %v3721_v7 }
 0x217   :  { %v2145_v24 = vcombine.high %v2143_v18, %v2143_v18  ;;  %v2157_v25 = vsel %vm2071_vm1, %v2144_v19, 0.0  ;;  %v2164_v43 = vsel %vm2071_vm1, %v2143_v18, 0.0  ;;  %v2239_v19 = vrot.slane %v2231_v8, %v3721_v7 }
 0x218   :  { %v2152_v26 = vadd.f32 %v2151_v23, %v2150_v22  ;;  %v2158_v27 = vrot.slane %v2157_v25, 4  ;;  %v2165_v28 = vrot.slane %v2164_v43, 4  ;;  %v2283_v22 = vrot.slane %v2269_v16, %v3721_v7 }
 0x219   :  { %v2171_v29 = vsel %vm2071_vm1, %v2145_v24, 0.0  ;;  %v2247_v24 = vcombine.low %v2239_v19, %v2246_v61 }
 0x21a   :  { %v2153_v30 = vrot.slane %v2152_v26, 2  ;;  %v2159_v31 = vadd.f32 %v2158_v27, %v2157_v25  ;;  %v2166_v21 = vadd.f32 %v2165_v28, %v2164_v43  ;;  %v2172_v15 = vrot.slane %v2171_v29, 4 }
 0x21b   :  { %v2284_v43 = vcombine.low %v2276_v0, %v2283_v22 }
 0x21c   :  { %v2154_v32 = vadd.f32 %v2153_v30, %v2152_v26  ;;  %v2160_v33 = vrot.slane %v2159_v31, 2  ;;  %v2167_v34 = vrot.slane %v2166_v21, 2  ;;  %v2173_v35 = vadd.f32 %v2172_v15, %v2171_v29 }
 0x21e   :  { %v2155_v36 = vrot.slane %v2154_v32, 1  ;;  %v2161_v20 = vadd.f32 %v2160_v33, %v2159_v31  ;;  %v2168_v37 = vadd.f32 %v2167_v34, %v2166_v21  ;;  %v2174_v38 = vrot.slane %v2173_v35, 2 }
 0x220   :  { %v2156_v39 = vadd.f32 %v2155_v36, %v2154_v32  ;;  %v2162_v40 = vrot.slane %v2161_v20, 1  ;;  %v2169_v41 = vrot.slane %v2168_v37, 1  ;;  %v2175_v42 = vadd.f32 %v2174_v38, %v2173_v35 }
 0x222   :  { %v2163_v44 = vadd.f32 %v2162_v40, %v2161_v20  ;;  %v2170_v45 = vadd.f32 %v2169_v41, %v2168_v37  ;;  %v2176_v46 = vrot.slane %v2175_v42, 1  ;;  %v2178_v47 = vmul.f32 0.5, %v2156_v39 }
 0x224   :  { %v2177_v48 = vadd.f32 %v2176_v46, %v2175_v42  ;;  %v2179_v49 = vmul.f32 0.5, %v2163_v44  ;;  %v2180_v50 = vmul.f32 0.5, %v2170_v45  ;;  %v2182_v51 = vadd.f32 1e-05, %v2178_v47 }
 0x226   :  { %v2181_v52 = vmul.f32 0.5, %v2177_v48  ;;  %v2183_v53 = vadd.f32 1e-05, %v2179_v49  ;;  %v2184_v54 = vadd.f32 1e-05, %v2180_v50  ;;  %3454 = vrsqrt.f32 %v2182_v51 }
 0x228   :  { %v2185_v55 = vadd.f32 1e-05, %v2181_v52  ;;  %3456 = vrsqrt.f32 %v2183_v53 }
 0x229   :  { %3458 = vrsqrt.f32 %v2184_v54 }
 0x22a   :  { %3460 = vrsqrt.f32 %v2185_v55 }
 0x230   :  { %v3455_v6 = vpop.eup %3454 }
 0x232   :  { %v3457_v10 = vpop.eup %3456 }
 0x233   :  { %v3459_v11 = vpop.eup %3458  ;;  %v2194_v12 = vcombine.low %v3455_v6, %v3457_v10 }
 0x234   :  { %v3461_v17 = vpop.eup %3460 }
 0x235   :  { %v2195_v18 = vcombine.low %v3459_v11, %v3461_v17  ;;  %v2202_v62 = vrot.slane %v2194_v12, %v3721_v7 }
 0x237   :  { %v2209_v63 = vrot.slane %v2195_v18, %v3721_v7 }
 0x239   :  { %v2210_v23 = vcombine.low %v2202_v62, %v2209_v63 }
 0x23b   :  { %v2212_v25 = vmul.f32 %v2210_v23, %v3738_v13  ;;  %v2930_v13 = vld [vmem:[%s3793_s7] ss:$0 sm:$0xff] }
 0x23d   :  { %v2249_v26 = vmul.f32 %v2247_v24, %v2212_v25 }
 0x23f   :  { %v2286_v27 = vadd.f32 %v2284_v43, %v2249_v26 }
 0x241   :  { %v2295_v28 = vrot.slane %v2286_v27, %v3721_v7  ;;  %v2288_v29 = vcombine.high %v2286_v27, %v2286_v27 }
 0x243   :  { %v2303_v30 = vcombine.high %v2295_v28, %v2295_v28  ;;  %v2302_v31 = vrot.slane %v2288_v29, %v3721_v7  ;;  %v2309_v32 = vpack.c.bf16 %v2295_v28, %v2295_v28 }
 0x245   :  { %v2310_v21 = vpack.c.bf16 %v2303_v30, %v2303_v30  ;;  %v2304_v15 = vcombine.high %v2302_v31, %v2302_v31  ;;  %v2311_v34 = vpack.c.bf16 %v2302_v31, %v2302_v31 }
 0x247   :  { %2608 = vmatprep.mubr.bf16.mxu0 %v2310_v21  ;;  %v2312_v33 = vpack.c.bf16 %v2304_v15, %v2304_v15 }
 0x248   :  { %2609 = vmatmul.mubr.bf16.vlgmr.msra.gmra.mrb[4].mxu0 %v2309_v32 }
 0x249   :  { %2648 = vmatprep.mubr.bf16.mxu1 %v2312_v33 }
 0x24a   :  { %2649 = vmatmul.mubr.bf16.vlgmr.msra.gmra.mrb[4].mxu1 %v2311_v34 }
 0x31b   :  { %v2979_v35 = vpop.f32.mrb[4].mxu0 }
 0x31c   :  { %v2980_v36 = vpop.f32.mrb[5].mxu0 }
 0x31d   :  { %v2981_v20 = vadd.f32 %v2980_v36, %v2979_v35  ;;  %v2982_v37 = vpop.f32.mrb[6].mxu0  ;;  %v3001_v38 = vpop.f32.mrb[4].mxu1 }
 0x31e   :  { %v2983_v39 = vpop.f32.mrb[7].mxu0  ;;  %v3002_v7 = vpop.f32.mrb[5].mxu1 }
 0x31f   :  { %v2611_v40 = vadd.f32 %v2981_v20, %v2930_v13  ;;  %v3003_v41 = vadd.f32 %v3002_v7, %v3001_v38  ;;  %v3004_v42 = vpop.f32.mrb[6].mxu1 }
 0x320   :  { %v3005_v44 = vpop.f32.mrb[7].mxu1 }
 0x321   :  { %v2651_v45 = vadd.f32 %v3003_v41, %v2611_v40 }
 0x323   :  { %2657 = vst.msk [vmem:[#allocation7] sm:$0x3] %vm2656_vm2, %v2651_v45 }
 0x324   :  { %3495 = shalt.err (!%p3492_p12)
}
 0x325   :  { %s3496_s20 = scalar_lea.hbm %s3794_s8, 32 }
 0x326   :  { %p3497_p13 = scmp.ne.s32.totalorder %s3794_s8, %s3496_s20  ;;  %p3500_p0 = scmp.lt.u32.totalorder %s3496_s20, %s3794_s8 }
 0x328   :  { %p3502_p1 = pnand %p3500_p0, %p3497_p13 }
 0x32a   :  { %3505 = shalt.err (!%p3502_p1)
}
 0x32b   :  { %2667 = dma.vmem_to_hbm [thread:$0]  %s2665_s2, 32, %s3794_s8, [#allocation6]  }
 0x32c   :  { %3508 = dma.done.wait [#allocation6], 32  }
 0x32d   :  { %3509 = vsyncadd [#allocation6], 4294967264 }
 0x32e   :  { %2671 = vsyncpa [#allocation5], 1 }
 0x32f   :  { %2672 = vsyncpa [#allocation6], 1 }

</bundles_post_ra>
